<compile_context>
chip_gen: v5e
topology: v5e:2x2
jax: 0.10.0
libtpu: 0.0.40
codegen_flags: <defaults>
</compile_context>

<pallas_src>
import jax
import jax.numpy as jnp
from jax import lax
from jax.experimental import pallas as pl
from jax.experimental.pallas import tpu as pltpu

LANE = 128
_VMEM_LIMIT = 32 * 1024 * 1024   # explicit; leaves headroom on v7x (64 MiB/TC)


def _round_up(a, b):
    return ((a + b - 1) // b) * b


# --------------------------- pass 1: conv + BN stats -------------------------
def _conv_stats_kernel(col_ref, w_ref, sum_ref, sq_ref):
    """cat = col @ w_cat (identity folded in => concat([x, conv])); accumulate
    per-channel sum / sum-of-squares into per-chunk resident accumulators.

    col_ref : (TM, K)        im2col rows (K = 9*Cin rounded to 8, NOT 128)
    w_ref   : (K, C_pad)     [identity | conv weight] in padded channel layout
    sum_ref : (1, 1, C_pad)  per-chunk channel-sum accumulator
    sq_ref  : (1, 1, C_pad)  per-chunk channel-sumsq accumulator
    """
    @pl.when(pl.program_id(1) == 0)
    def _init():
        sum_ref[...] = jnp.zeros_like(sum_ref)
        sq_ref[...] = jnp.zeros_like(sq_ref)

    cat = jnp.dot(col_ref[...], w_ref[...], preferred_element_type=jnp.float32)
    # TODO(synk): E[x^2]-E[x]^2 in plain f32 can lose precision at full
    # DenseNet scale; switch to a shifted / Welford accumulation if needed.
    sum_ref[...] += jnp.expand_dims(jnp.sum(cat, axis=0, keepdims=True), 0)
    sq_ref[...] += jnp.expand_dims(jnp.sum(cat * cat, axis=0, keepdims=True), 0)


# -------------------- pass 2: conv (recomputed) + BN + ReLU ------------------
def _conv_bn_relu_kernel(col_ref, w_ref, scale_ref, shift_ref, out_ref):
    """out = relu((col @ w_cat) * scale + shift), lane-dense f32 stores."""
    cat = jnp.dot(col_ref[...], w_ref[...], preferred_element_type=jnp.float32)
    out_ref[...] = jnp.maximum(cat * scale_ref[...] + shift_ref[...], 0.0)


def conv_block_forward(x_nchw, w_oihw, gamma, beta, *, tile_m=1024,
                       matmul_dtype=jnp.bfloat16):
    """ConvBlock forward. x_nchw: (N, Cin, H, W); w_oihw: (Cg, Cin, 3, 3)."""
    N, Cin, H, W = x_nchw.shape
    Cg = w_oihw.shape[0]
    Ctot = Cin + Cg
    M = N * H * W
    K = 9 * Cin

    # Channels padded to a lane (lane-dense output stores); K only rounded to
    # a sublane multiple so the dominant col stream stays small in HBM.
    c_pad = _round_up(Ctot, LANE)
    k_hbm = _round_up(K, 8)
    tm = min(tile_m, _round_up(M, 8))
    m_pad = _round_up(M, tm)
    n_tiles = m_pad // tm
    # Leading "parallel" chunk axis lets both v7x TensorCores run pass 1.
    n_chunks = 2 if (n_tiles % 2 == 0 and n_tiles >= 2) else 1
    tiles_per_chunk = n_tiles // n_chunks

    # ---- glue: NCHW -> NHWC (cast folded in), halo pad, im2col -------------
    # TODO(synk): build im2col in-kernel from a haloed x tile (pl.ANY + manual
    # DMA) to avoid materializing the 9x-wide col tensor in HBM at all.
    x_nhwc = jnp.transpose(x_nchw, (0, 2, 3, 1)).astype(matmul_dtype)
    xpad = jnp.pad(x_nhwc, ((0, 0), (1, 1), (1, 1), (0, 0)))
    taps = [xpad[:, dy:dy + H, dx:dx + W, :]
            for dy in range(3) for dx in range(3)]
    col = jnp.concatenate(taps, axis=-1).reshape(M, K)        # (dy, dx, ci)
    col_p = jnp.pad(col, ((0, m_pad - M), (0, k_hbm - K)))

    # Combined weight: conv weight in channels [Cin, Ctot); identity on the
    # center tap in channels [0, Cin)  =>  dot(col, w_cat) == concat([x, y]).
    w_hwio = jnp.transpose(w_oihw, (2, 3, 1, 0)).astype(jnp.float32)
    w_flat = w_hwio.reshape(K, Cg)                            # matches im2col order
    w_cat = jnp.zeros((k_hbm, c_pad), jnp.float32)
    w_cat = w_cat.at[:K, Cin:Ctot].set(w_flat)
    w_cat = w_cat.at[4 * Cin:5 * Cin, :Cin].set(jnp.eye(Cin, dtype=jnp.float32))
    w_cat = w_cat.astype(matmul_dtype)

    params_stats = pltpu.CompilerParams(
        dimension_semantics=("parallel", "arbitrary"),   # chunks || / tiles reduce
        vmem_limit_bytes=_VMEM_LIMIT)
    params_fused = pltpu.CompilerParams(
        dimension_semantics=("parallel",),
        vmem_limit_bytes=_VMEM_LIMIT)

    itemsize = jnp.dtype(matmul_dtype).itemsize
    col_bytes = m_pad * k_hbm * itemsize
    w_bytes = k_hbm * c_pad * itemsize
    mm_flops = 2 * m_pad * k_hbm * c_pad
    cost1 = pl.CostEstimate(
        flops=mm_flops + 3 * m_pad * c_pad, transcendentals=0,
        bytes_accessed=col_bytes + w_bytes + 2 * n_chunks * c_pad * 4)
    cost2 = pl.CostEstimate(
        flops=mm_flops + 3 * m_pad * c_pad, transcendentals=0,
        bytes_accessed=col_bytes + w_bytes + 2 * c_pad * 4 + m_pad * c_pad * 4)

    # ---- pass 1 (stats only): per-channel sum / sumsq of concat([x, conv]) -
    csum, csq = pl.pallas_call(
        _conv_stats_kernel,
        out_shape=(
            jax.ShapeDtypeStruct((n_chunks, 1, c_pad), jnp.float32),
            jax.ShapeDtypeStruct((n_chunks, 1, c_pad), jnp.float32),
        ),
        grid=(n_chunks, tiles_per_chunk),
        in_specs=[
            pl.BlockSpec((tm, k_hbm), lambda p, t: (p * tiles_per_chunk + t, 0)),
            pl.BlockSpec((k_hbm, c_pad), lambda p, t: (0, 0)),     # weight resident
        ],
        out_specs=(
            pl.BlockSpec((1, 1, c_pad), lambda p, t: (p, 0, 0)),   # accumulator
            pl.BlockSpec((1, 1, c_pad), lambda p, t: (p, 0, 0)),   # accumulator
        ),
        compiler_params=params_stats,
        cost_estimate=cost1,
    )(col_p, w_cat)

    # ---- tiny O(C) stats combine (f32, biased variance, eps = 1e-5) --------
    count = jnp.float32(M)               # zero-padded rows contribute nothing
    mean = jnp.sum(csum, axis=(0, 1)) / count
    var = jnp.maximum(jnp.sum(csq, axis=(0, 1)) / count - mean * mean, 0.0)
    gamma_p = jnp.pad(gamma.astype(jnp.float32), (0, c_pad - Ctot))
    beta_p = jnp.pad(beta.astype(jnp.float32), (0, c_pad - Ctot))
    scale = (gamma_p * lax.rsqrt(var + 1e-5)).reshape(1, c_pad)
    shift = (beta_p - mean * scale[0]).reshape(1, c_pad)

    # ---- pass 2 (fused): recompute conv matmul, BN scale/shift, ReLU -------
    out_p = pl.pallas_call(
        _conv_bn_relu_kernel,
        out_shape=jax.ShapeDtypeStruct((m_pad, c_pad), jnp.float32),
        grid=(n_tiles,),
        in_specs=[
            pl.BlockSpec((tm, k_hbm), lambda t: (t, 0)),
            pl.BlockSpec((k_hbm, c_pad), lambda t: (0, 0)),
            pl.BlockSpec((1, c_pad), lambda t: (0, 0)),
            pl.BlockSpec((1, c_pad), lambda t: (0, 0)),
        ],
        out_specs=pl.BlockSpec((tm, c_pad), lambda t: (t, 0)),
        compiler_params=params_fused,
        cost_estimate=cost2,
    )(col_p, w_cat, scale, shift)

    out = out_p[:M, :Ctot].reshape(N, H, W, Ctot)
    return jnp.transpose(out, (0, 3, 1, 2))                     # back to NCHW


def reference_forward(x_nchw, w_oihw, gamma, beta):
    """Pure-JAX reference (mirrors PyTorch training-mode ConvBlock)."""
    x_nhwc = jnp.transpose(x_nchw, (0, 2, 3, 1)).astype(jnp.float32)
    w_hwio = jnp.transpose(w_oihw, (2, 3, 1, 0)).astype(jnp.float32)
    y = lax.conv_general_dilated(
        x_nhwc, w_hwio, window_strides=(1, 1), padding=((1, 1), (1, 1)),
        dimension_numbers=("NHWC", "HWIO", "NHWC"))
    cat = jnp.concatenate([x_nhwc, y], axis=-1)
    mean = jnp.mean(cat, axis=(0, 1, 2), keepdims=True)
    var = jnp.mean((cat - mean) ** 2, axis=(0, 1, 2), keepdims=True)
    out = (cat - mean) * lax.rsqrt(var + 1e-5) * gamma + beta
    out = jnp.maximum(out, 0.0)
    return jnp.transpose(out, (0, 3, 1, 2))


if __name__ == "__main__":
    # Small shapes consistent with the module.
    N, Cin, H, W = 2, 4, 16, 16
    growth_rate = 8
    Ctot = Cin + growth_rate

    key = jax.random.PRNGKey(0)
    k_x, k_w, k_g, k_b = jax.random.split(key, 4)

    x = jax.random.normal(k_x, (N, Cin, H, W), dtype=jnp.float32)
    # Conv2d weight (out, in, kh, kw), bias=False.
    w = 0.1 * jax.random.normal(k_w, (growth_rate, Cin, 3, 3), dtype=jnp.float32)
    # BatchNorm affine params (randomized to exercise the affine path).
    gamma = 1.0 + 0.1 * jax.random.normal(k_g, (Ctot,), dtype=jnp.float32)
    beta = 0.1 * jax.random.normal(k_b, (Ctot,), dtype=jnp.float32)

    ref = jax.block_until_ready(reference_forward(x, w, gamma, beta))

    # Tight correctness check with f32 MXU operands.
    fwd_f32 = jax.jit(
        lambda *a: conv_block_forward(*a, matmul_dtype=jnp.float32))
    out_f32 = jax.block_until_ready(fwd_f32(x, w, gamma, beta))
    assert out_f32.shape == (N, Ctot, H, W), out_f32.shape
    err_f32 = float(jnp.max(jnp.abs(out_f32 - ref)))
    assert jnp.allclose(out_f32, ref, rtol=1e-3, atol=2e-3), err_f32

    # Default perf path: bf16 MXU operands, f32 accumulation & BN math.
    fwd = jax.jit(conv_block_forward)
    out_bf16 = jax.block_until_ready(fwd(x, w, gamma, beta))
    err_bf16 = float(jnp.max(jnp.abs(out_bf16 - ref)))
    assert jnp.allclose(out_bf16, ref, rtol=1e-1, atol=1e-1), err_bf16

    print("KERNEL_OK")
</pallas_src>

<mosaic_0001>
module attributes {stable_mosaic.version = 11 : i64} {
  func.func @_conv_stats_kernel(%arg0: i32, %arg1: i32, %arg2: memref<512x40xf32, #tpu.memory_space<vmem>>, %arg3: memref<40x128xf32, #tpu.memory_space<vmem>>, %arg4: memref<1x1x128xf32, #tpu.memory_space<vmem>>, %arg5: memref<1x1x128xf32, #tpu.memory_space<vmem>>) attributes {dimension_semantics = [#tpu.dimension_semantics<parallel>, #tpu.dimension_semantics<arbitrary>], iteration_bounds = array<i64: 1, 1>, scalar_prefetch = 0 : i64, scratch_operands = 0 : i64, tpu.core_type = #tpu.core_type<tc>, window_params = [{transform_indices = @transform_0, window_bounds = array<i64: 512, 40>}, {pipeline_mode = #tpu.pipeline_mode<synchronous>, transform_indices = @transform_1, window_bounds = array<i64: 40, 128>}, {transform_indices = @transform_2, window_bounds = array<i64: 1, 1, 128>}, {transform_indices = @transform_3, window_bounds = array<i64: 1, 1, 128>}]} {
    %c0_i32 = arith.constant 0 : i32
    %0 = arith.cmpi eq, %arg1, %c0_i32 : i32
    %1 = arith.extui %0 : i1 to i32
    %c0_i32_0 = arith.constant 0 : i32
    %2 = arith.cmpi ne, %1, %c0_i32_0 : i32
    scf.if %2 {
      %cst_18 = arith.constant 0.000000e+00 : f32
      %19 = vector.broadcast %cst_18 : f32 to vector<1x1x128xf32>
      %c0_19 = arith.constant 0 : index
      %c0_20 = arith.constant 0 : index
      %c0_21 = arith.constant 0 : index
      %20 = vector.load %arg4[%c0_19, %c0_20, %c0_21] : memref<1x1x128xf32, #tpu.memory_space<vmem>>, vector<1x1x128xf32>
      tpu.vector_store %arg4[%c0_19, %c0_20, %c0_21], %19 {strides = array<i32>} : memref<1x1x128xf32, #tpu.memory_space<vmem>>, vector<1x1x128xf32>,
      %cst_22 = arith.constant 0.000000e+00 : f32
      %21 = vector.broadcast %cst_22 : f32 to vector<1x1x128xf32>
      %c0_23 = arith.constant 0 : index
      %c0_24 = arith.constant 0 : index
      %c0_25 = arith.constant 0 : index
      %22 = vector.load %arg5[%c0_23, %c0_24, %c0_25] : memref<1x1x128xf32, #tpu.memory_space<vmem>>, vector<1x1x128xf32>
      tpu.vector_store %arg5[%c0_23, %c0_24, %c0_25], %21 {strides = array<i32>} : memref<1x1x128xf32, #tpu.memory_space<vmem>>, vector<1x1x128xf32>,
    } else {
    }
    %c0 = arith.constant 0 : index
    %c0_1 = arith.constant 0 : index
    %3 = vector.load %arg2[%c0, %c0_1] : memref<512x40xf32, #tpu.memory_space<vmem>>, vector<512x40xf32>
    %c0_2 = arith.constant 0 : index
    %c0_3 = arith.constant 0 : index
    %4 = vector.load %arg3[%c0_2, %c0_3] : memref<40x128xf32, #tpu.memory_space<vmem>>, vector<40x128xf32>
    %cst = arith.constant dense<0.000000e+00> : vector<512x128xf32>
    %5 = tpu.matmul %3, %4, %cst {dimension_numbers = #tpu.dot_dimension_numbers<[1], [0], [0], [1], [0, 0, 1, 1], [], []>} : vector<512x40xf32>, vector<40x128xf32>, vector<512x128xf32> -> vector<512x128xf32>
    %c0_4 = arith.constant 0 : index
    %c0_5 = arith.constant 0 : index
    %c0_6 = arith.constant 0 : index
    %6 = vector.load %arg4[%c0_4, %c0_5, %c0_6] : memref<1x1x128xf32, #tpu.memory_space<vmem>>, vector<1x1x128xf32>
    %cst_7 = arith.constant dense<0.000000e+00> : vector<128xf32>
    %7 = vector.multi_reduction <add>, %5, %cst_7 [0] : vector<512x128xf32> to vector<128xf32>
    %8 = vector.shape_cast %7 : vector<128xf32> to vector<1x128xf32>
    %9 = vector.shape_cast %8 : vector<1x128xf32> to vector<1x1x128xf32>
    %10 = arith.addf %6, %9 : vector<1x1x128xf32>
    %c0_8 = arith.constant 0 : index
    %c0_9 = arith.constant 0 : index
    %c0_10 = arith.constant 0 : index
    %11 = vector.load %arg4[%c0_8, %c0_9, %c0_10] : memref<1x1x128xf32, #tpu.memory_space<vmem>>, vector<1x1x128xf32>
    tpu.vector_store %arg4[%c0_8, %c0_9, %c0_10], %10 {strides = array<i32>} : memref<1x1x128xf32, #tpu.memory_space<vmem>>, vector<1x1x128xf32>,
    %c0_11 = arith.constant 0 : index
    %c0_12 = arith.constant 0 : index
    %c0_13 = arith.constant 0 : index
    %12 = vector.load %arg5[%c0_11, %c0_12, %c0_13] : memref<1x1x128xf32, #tpu.memory_space<vmem>>, vector<1x1x128xf32>
    %13 = arith.mulf %5, %5 : vector<512x128xf32>
    %cst_14 = arith.constant dense<0.000000e+00> : vector<128xf32>
    %14 = vector.multi_reduction <add>, %13, %cst_14 [0] : vector<512x128xf32> to vector<128xf32>
    %15 = vector.shape_cast %14 : vector<128xf32> to vector<1x128xf32>
    %16 = vector.shape_cast %15 : vector<1x128xf32> to vector<1x1x128xf32>
    %17 = arith.addf %12, %16 : vector<1x1x128xf32>
    %c0_15 = arith.constant 0 : index
    %c0_16 = arith.constant 0 : index
    %c0_17 = arith.constant 0 : index
    %18 = vector.load %arg5[%c0_15, %c0_16, %c0_17] : memref<1x1x128xf32, #tpu.memory_space<vmem>>, vector<1x1x128xf32>
    tpu.vector_store %arg5[%c0_15, %c0_16, %c0_17], %17 {strides = array<i32>} : memref<1x1x128xf32, #tpu.memory_space<vmem>>, vector<1x1x128xf32>,
    return
  }
  func.func @transform_0(%arg0: i32, %arg1: i32) -> (i32, i32) {
    %c1_i32 = arith.constant 1 : i32
    %0 = arith.muli %arg0, %c1_i32 : i32
    %1 = arith.addi %0, %arg1 : i32
    %c0_i32 = arith.constant 0 : i32
    %c0_i32_0 = arith.constant 0 : i32
    return %1, %c0_i32 : i32, i32
  }
  func.func @transform_1(%arg0: i32, %arg1: i32) -> (i32, i32) {
    %c0_i32 = arith.constant 0 : i32
    %c0_i32_0 = arith.constant 0 : i32
    %c0_i32_1 = arith.constant 0 : i32
    return %c0_i32, %c0_i32_0 : i32, i32
  }
  func.func @transform_2(%arg0: i32, %arg1: i32) -> (i32, i32, i32) {
    %c0_i32 = arith.constant 0 : i32
    %c0_i32_0 = arith.constant 0 : i32
    %c0_i32_1 = arith.constant 0 : i32
    return %arg0, %c0_i32, %c0_i32_0 : i32, i32, i32
  }
  func.func @transform_3(%arg0: i32, %arg1: i32) -> (i32, i32, i32) {
    %c0_i32 = arith.constant 0 : i32
    %c0_i32_0 = arith.constant 0 : i32
    %c0_i32_1 = arith.constant 0 : i32
    return %arg0, %c0_i32, %c0_i32_0 : i32, i32, i32
  }
}

module attributes {stable_mosaic.version = 11 : i64} {
  func.func @_conv_bn_relu_kernel(%arg0: i32, %arg1: memref<512x40xf32, #tpu.memory_space<vmem>>, %arg2: memref<40x128xf32, #tpu.memory_space<vmem>>, %arg3: memref<1x128xf32, #tpu.memory_space<vmem>>, %arg4: memref<1x128xf32, #tpu.memory_space<vmem>>, %arg5: memref<512x128xf32, #tpu.memory_space<vmem>>) attributes {dimension_semantics = [#tpu.dimension_semantics<parallel>], iteration_bounds = array<i64: 1>, scalar_prefetch = 0 : i64, scratch_operands = 0 : i64, tpu.core_type = #tpu.core_type<tc>, window_params = [{transform_indices = @transform_0, window_bounds = array<i64: 512, 40>}, {pipeline_mode = #tpu.pipeline_mode<synchronous>, transform_indices = @transform_1, window_bounds = array<i64: 40, 128>}, {pipeline_mode = #tpu.pipeline_mode<synchronous>, transform_indices = @transform_2, window_bounds = array<i64: 1, 128>}, {pipeline_mode = #tpu.pipeline_mode<synchronous>, transform_indices = @transform_3, window_bounds = array<i64: 1, 128>}, {transform_indices = @transform_4, window_bounds = array<i64: 512, 128>}]} {
    %c0 = arith.constant 0 : index
    %c0_0 = arith.constant 0 : index
    %0 = vector.load %arg1[%c0, %c0_0] : memref<512x40xf32, #tpu.memory_space<vmem>>, vector<512x40xf32>
    %c0_1 = arith.constant 0 : index
    %c0_2 = arith.constant 0 : index
    %1 = vector.load %arg2[%c0_1, %c0_2] : memref<40x128xf32, #tpu.memory_space<vmem>>, vector<40x128xf32>
    %cst = arith.constant dense<0.000000e+00> : vector<512x128xf32>
    %2 = tpu.matmul %0, %1, %cst {dimension_numbers = #tpu.dot_dimension_numbers<[1], [0], [0], [1], [0, 0, 1, 1], [], []>} : vector<512x40xf32>, vector<40x128xf32>, vector<512x128xf32> -> vector<512x128xf32>
    %c0_3 = arith.constant 0 : index
    %c0_4 = arith.constant 0 : index
    %3 = vector.load %arg3[%c0_3, %c0_4] : memref<1x128xf32, #tpu.memory_space<vmem>>, vector<1x128xf32>
    %4 = vector.broadcast %3 : vector<1x128xf32> to vector<512x128xf32>
    %5 = arith.mulf %2, %4 : vector<512x128xf32>
    %c0_5 = arith.constant 0 : index
    %c0_6 = arith.constant 0 : index
    %6 = vector.load %arg4[%c0_5, %c0_6] : memref<1x128xf32, #tpu.memory_space<vmem>>, vector<1x128xf32>
    %7 = vector.broadcast %6 : vector<1x128xf32> to vector<512x128xf32>
    %8 = arith.addf %5, %7 : vector<512x128xf32>
    %cst_7 = arith.constant 0.000000e+00 : f32
    %9 = vector.broadcast %cst_7 : f32 to vector<512x128xf32>
    %10 = arith.maximumf %8, %9 : vector<512x128xf32>
    %c0_8 = arith.constant 0 : index
    %c0_9 = arith.constant 0 : index
    %11 = vector.load %arg5[%c0_8, %c0_9] : memref<512x128xf32, #tpu.memory_space<vmem>>, vector<512x128xf32>
    tpu.vector_store %arg5[%c0_8, %c0_9], %10 {strides = array<i32>} : memref<512x128xf32, #tpu.memory_space<vmem>>, vector<512x128xf32>,
    return
  }
  func.func @transform_0(%arg0: i32) -> (i32, i32) {
    %c0_i32 = arith.constant 0 : i32
    %c0_i32_0 = arith.constant 0 : i32
    return %arg0, %c0_i32 : i32, i32
  }
  func.func @transform_1(%arg0: i32) -> (i32, i32) {
    %c0_i32 = arith.constant 0 : i32
    %c0_i32_0 = arith.constant 0 : i32
    %c0_i32_1 = arith.constant 0 : i32
    return %c0_i32, %c0_i32_0 : i32, i32
  }
  func.func @transform_2(%arg0: i32) -> (i32, i32) {
    %c0_i32 = arith.constant 0 : i32
    %c0_i32_0 = arith.constant 0 : i32
    %c0_i32_1 = arith.constant 0 : i32
    return %c0_i32, %c0_i32_0 : i32, i32
  }
  func.func @transform_3(%arg0: i32) -> (i32, i32) {
    %c0_i32 = arith.constant 0 : i32
    %c0_i32_0 = arith.constant 0 : i32
    %c0_i32_1 = arith.constant 0 : i32
    return %c0_i32, %c0_i32_0 : i32, i32
  }
  func.func @transform_4(%arg0: i32) -> (i32, i32) {
    %c0_i32 = arith.constant 0 : i32
    %c0_i32_0 = arith.constant 0 : i32
    return %arg0, %c0_i32 : i32, i32
  }
}

</mosaic_0001>

<bundles_post_ra>
// kernel: _lambda_.3
= control target key start
LH: loop header
LB: loop body
LE: loop exit
PB: predicated region body
PF: predicated region fallthrough
CT: control target
= control target key end

     0   :  { %vm86_vm0 = vcmask 326656   ;;  %s1463_s1 = inlined_call_operand.vmem [shape: f32[40,128], index: 1, kind: input, shape index: {}]   ;;  %s1464_s0 = inlined_call_operand.vmem [shape: f32[512,40], index: 0, kind: input, shape index: {}]   ;;  %s1465_s2 = inlined_call_operand.vmem [shape: f32[1,128], index: 2, kind: input, shape index: {}]   ;;  %s1466_s3 = inlined_call_operand.vmem [shape: f32[1,128], index: 3, kind: input, shape index: {}]   ;;  %s1467_s4 = inlined_call_operand.vmem [shape: f32[512,128], index: 4, kind: output, shape index: {}]  }
   0x1   :  { %v85_v0 = vld [vmem:[%s1463_s1 + $0x20] sm:$0xff]  ;;  %v84_v1 = vld [vmem:[%s1463_s1 + $0x18] sm:$0xff]  ;;  %v83_v2 = vld [vmem:[%s1463_s1 + $0x10] sm:$0xff] }
   0x2   :  { %821 = vmatpush.msra.mxu2 %v85_v0  ;;  %822 = vmatpush.msra.mxu3 %v85_v0  ;;  %v82_v3 = vld [vmem:[%s1463_s1 + $0x8] sm:$0xff]  ;;  %v81_v4 = vld [vmem:[%s1463_s1] sm:$0xff]  ;;  %v51_v13 = vld [vmem:[%s1464_s0 + $0x110] sm:$0xff] }
   0x3   :  { %290 = vmatpush.msra.mxu0 %v85_v0  ;;  %820 = vmatpush.msra.mxu1 %v85_v0  ;;  %v49_v5 = vld [vmem:[%s1464_s0 + $0x100] sm:$0xff]  ;;  %v50_v9 = vld [vmem:[%s1464_s0 + $0x108] sm:$0xff]  ;;  %v67_v14 = vld [vmem:[%s1464_s0 + $0x190] sm:$0xff] }
   0x4   :  { %824 = vmatpush.msra.mxu2 %v84_v1  ;;  %825 = vmatpush.msra.mxu3 %v84_v1  ;;  %v65_v6 = vld [vmem:[%s1464_s0 + $0x180] sm:$0xff]  ;;  %v66_v10 = vld [vmem:[%s1464_s0 + $0x188] sm:$0xff]  ;;  %v19_v15 = vld [vmem:[%s1464_s0 + $0x10] sm:$0xff] }
   0x5   :  { %291 = vmatpush.msra.mxu0 %v84_v1  ;;  %823 = vmatpush.msra.mxu1 %v84_v1  ;;  %v17_v7 = vld [vmem:[%s1464_s0] sm:$0xff]  ;;  %v18_v11 = vld [vmem:[%s1464_s0 + $0x8] sm:$0xff]  ;;  %v35_v16 = vld [vmem:[%s1464_s0 + $0x90] sm:$0xff] }
   0x6   :  { %827 = vmatpush.msra.mxu2 %v83_v2  ;;  %828 = vmatpush.msra.mxu3 %v83_v2  ;;  %v33_v8 = vld [vmem:[%s1464_s0 + $0x80] sm:$0xff]  ;;  %v34_v12 = vld [vmem:[%s1464_s0 + $0x88] sm:$0xff]  ;;  %v52_v17 = vld [vmem:[%s1464_s0 + $0x118] sm:$0xff] }
   0x7   :  { %292 = vmatpush.msra.mxu0 %v83_v2  ;;  %826 = vmatpush.msra.mxu1 %v83_v2  ;;  %v68_v18 = vld [vmem:[%s1464_s0 + $0x198] sm:$0xff]  ;;  %v53_v21 = vld [vmem:[%s1464_s0 + $0x120] sm:$0xff]  ;;  %v54_v25 = vld [vmem:[%s1464_s0 + $0x128] sm:$0xff] }
   0x8   :  { %830 = vmatpush.msra.mxu2 %v82_v3  ;;  %831 = vmatpush.msra.mxu3 %v82_v3  ;;  %v20_v19 = vld [vmem:[%s1464_s0 + $0x18] sm:$0xff]  ;;  %v69_v22 = vld [vmem:[%s1464_s0 + $0x1a0] sm:$0xff]  ;;  %v70_v26 = vld [vmem:[%s1464_s0 + $0x1a8] sm:$0xff] }
   0x9   :  { %293 = vmatpush.msra.mxu0 %v82_v3  ;;  %829 = vmatpush.msra.mxu1 %v82_v3  ;;  %v36_v20 = vld [vmem:[%s1464_s0 + $0x98] sm:$0xff]  ;;  %v21_v23 = vld [vmem:[%s1464_s0 + $0x20] sm:$0xff]  ;;  %v22_v27 = vld [vmem:[%s1464_s0 + $0x28] sm:$0xff] }
   0xa   :  { %833 = vmatpush.msra.mxu2 %v81_v4  ;;  %834 = vmatpush.msra.mxu3 %v81_v4  ;;  %v37_v24 = vld [vmem:[%s1464_s0 + $0xa0] sm:$0xff]  ;;  %v38_v28 = vld [vmem:[%s1464_s0 + $0xa8] sm:$0xff]  ;;  %v55_v29 = vld [vmem:[%s1464_s0 + $0x130] sm:$0xff] }
   0xb   :  { %788 = vmatmul.msk.f32.vlgmr.msra.gmra.mxu2 %vm86_vm0, %v49_v5  ;;  %804 = vmatmul.msk.f32.vlgmr.msra.gmra.mxu3 %vm86_vm0, %v65_v6  ;;  %v71_v30 = vld [vmem:[%s1464_s0 + $0x1b0] sm:$0xff]  ;;  %v56_v33 = vld [vmem:[%s1464_s0 + $0x138] sm:$0xff]  ;;  %v57_v37 = vld [vmem:[%s1464_s0 + $0x140] sm:$0xff] }
   0xc   :  { %294 = vmatpush.msra.mxu0 %v81_v4  ;;  %832 = vmatpush.msra.mxu1 %v81_v4  ;;  %v23_v31 = vld [vmem:[%s1464_s0 + $0x30] sm:$0xff]  ;;  %v72_v34 = vld [vmem:[%s1464_s0 + $0x1b8] sm:$0xff]  ;;  %v73_v38 = vld [vmem:[%s1464_s0 + $0x1c0] sm:$0xff] }
   0xd   :  { %756 = vmatmul.msk.f32.vlgmr.msra.gmra.mxu0 %vm86_vm0, %v17_v7  ;;  %772 = vmatmul.msk.f32.vlgmr.msra.gmra.mxu1 %vm86_vm0, %v33_v8  ;;  %v39_v32 = vld [vmem:[%s1464_s0 + $0xb0] sm:$0xff]  ;;  %v24_v35 = vld [vmem:[%s1464_s0 + $0x38] sm:$0xff]  ;;  %v25_v39 = vld [vmem:[%s1464_s0 + $0x40] sm:$0xff] }
   0xe   :  { %v40_v36 = vld [vmem:[%s1464_s0 + $0xb8] sm:$0xff]  ;;  %v41_v40 = vld [vmem:[%s1464_s0 + $0xc0] sm:$0xff]  ;;  %v58_v41 = vld [vmem:[%s1464_s0 + $0x148] sm:$0xff] }
   0xf   :  { %v74_v42 = vld [vmem:[%s1464_s0 + $0x1c8] sm:$0xff]  ;;  %v59_v45 = vld [vmem:[%s1464_s0 + $0x150] sm:$0xff]  ;;  %v60_v49 = vld [vmem:[%s1464_s0 + $0x158] sm:$0xff] }
  0x10   :  { %v26_v43 = vld [vmem:[%s1464_s0 + $0x48] sm:$0xff]  ;;  %v75_v46 = vld [vmem:[%s1464_s0 + $0x1d0] sm:$0xff]  ;;  %v76_v50 = vld [vmem:[%s1464_s0 + $0x1d8] sm:$0xff] }
  0x11   :  { %v42_v44 = vld [vmem:[%s1464_s0 + $0xc8] sm:$0xff]  ;;  %v27_v47 = vld [vmem:[%s1464_s0 + $0x50] sm:$0xff]  ;;  %v28_v51 = vld [vmem:[%s1464_s0 + $0x58] sm:$0xff] }
  0x12   :  { %v43_v48 = vld [vmem:[%s1464_s0 + $0xd0] sm:$0xff]  ;;  %v44_v52 = vld [vmem:[%s1464_s0 + $0xd8] sm:$0xff]  ;;  %v61_v53 = vld [vmem:[%s1464_s0 + $0x160] sm:$0xff] }
  0x13   :  { %789 = vmatmul.msk.f32.gmra.mxu2 %vm86_vm0, %v50_v9  ;;  %805 = vmatmul.msk.f32.gmra.mxu3 %vm86_vm0, %v66_v10  ;;  %v77_v54 = vld [vmem:[%s1464_s0 + $0x1e0] sm:$0xff]  ;;  %v62_v57 = vld [vmem:[%s1464_s0 + $0x168] sm:$0xff]  ;;  %v63_v61 = vld [vmem:[%s1464_s0 + $0x170] sm:$0xff] }
  0x14   :  { %v29_v55 = vld [vmem:[%s1464_s0 + $0x60] sm:$0xff]  ;;  %v78_v58 = vld [vmem:[%s1464_s0 + $0x1e8] sm:$0xff]  ;;  %v79_v62 = vld [vmem:[%s1464_s0 + $0x1f0] sm:$0xff] }
  0x15   :  { %757 = vmatmul.msk.f32.gmra.mxu0 %vm86_vm0, %v18_v11  ;;  %773 = vmatmul.msk.f32.gmra.mxu1 %vm86_vm0, %v34_v12  ;;  %v45_v56 = vld [vmem:[%s1464_s0 + $0xe0] sm:$0xff]  ;;  %v30_v59 = vld [vmem:[%s1464_s0 + $0x68] sm:$0xff]  ;;  %v31_v63 = vld [vmem:[%s1464_s0 + $0x70] sm:$0xff] }
  0x16   :  { %v46_v60 = vld [vmem:[%s1464_s0 + $0xe8] sm:$0xff]  ;;  %v47_v0 = vld [vmem:[%s1464_s0 + $0xf0] sm:$0xff]  ;;  %v64_v1 = vld [vmem:[%s1464_s0 + $0x178] sm:$0xff] }
  0x17   :  { %v80_v2 = vld [vmem:[%s1464_s0 + $0x1f8] sm:$0xff]  ;;  %v1136_v5 = vld [vmem:[%s1465_s2] ss:$0 sm:$0xff] }
  0x18   :  { %v32_v3 = vld [vmem:[%s1464_s0 + $0x78] sm:$0xff]  ;;  %v1141_v6 = vld [vmem:[%s1466_s3] ss:$0 sm:$0xff] }
  0x19   :  { %v48_v4 = vld [vmem:[%s1464_s0 + $0xf8] sm:$0xff] }
  0x1b   :  { %790 = vmatmul.msk.f32.gmra.mxu2 %vm86_vm0, %v51_v13  ;;  %806 = vmatmul.msk.f32.gmra.mxu3 %vm86_vm0, %v67_v14 }
  0x1d   :  { %758 = vmatmul.msk.f32.gmra.mxu0 %vm86_vm0, %v19_v15  ;;  %774 = vmatmul.msk.f32.gmra.mxu1 %vm86_vm0, %v35_v16 }
  0x23   :  { %791 = vmatmul.msk.f32.gmra.mxu2 %vm86_vm0, %v52_v17  ;;  %807 = vmatmul.msk.f32.gmra.mxu3 %vm86_vm0, %v68_v18 }
  0x25   :  { %759 = vmatmul.msk.f32.gmra.mxu0 %vm86_vm0, %v20_v19  ;;  %775 = vmatmul.msk.f32.gmra.mxu1 %vm86_vm0, %v36_v20 }
  0x2b   :  { %792 = vmatmul.msk.f32.gmra.mxu2 %vm86_vm0, %v53_v21  ;;  %808 = vmatmul.msk.f32.gmra.mxu3 %vm86_vm0, %v69_v22 }
  0x2d   :  { %760 = vmatmul.msk.f32.gmra.mxu0 %vm86_vm0, %v21_v23  ;;  %776 = vmatmul.msk.f32.gmra.mxu1 %vm86_vm0, %v37_v24 }
  0x33   :  { %793 = vmatmul.msk.f32.gmra.mxu2 %vm86_vm0, %v54_v25  ;;  %809 = vmatmul.msk.f32.gmra.mxu3 %vm86_vm0, %v70_v26 }
  0x35   :  { %761 = vmatmul.msk.f32.gmra.mxu0 %vm86_vm0, %v22_v27  ;;  %777 = vmatmul.msk.f32.gmra.mxu1 %vm86_vm0, %v38_v28 }
  0x3b   :  { %794 = vmatmul.msk.f32.gmra.mxu2 %vm86_vm0, %v55_v29  ;;  %810 = vmatmul.msk.f32.gmra.mxu3 %vm86_vm0, %v71_v30 }
  0x3d   :  { %762 = vmatmul.msk.f32.gmra.mxu0 %vm86_vm0, %v23_v31  ;;  %778 = vmatmul.msk.f32.gmra.mxu1 %vm86_vm0, %v39_v32 }
  0x43   :  { %795 = vmatmul.msk.f32.gmra.mxu2 %vm86_vm0, %v56_v33  ;;  %811 = vmatmul.msk.f32.gmra.mxu3 %vm86_vm0, %v72_v34 }
  0x45   :  { %763 = vmatmul.msk.f32.gmra.mxu0 %vm86_vm0, %v24_v35  ;;  %779 = vmatmul.msk.f32.gmra.mxu1 %vm86_vm0, %v40_v36 }
  0x4b   :  { %796 = vmatmul.msk.f32.gmra.mxu2 %vm86_vm0, %v57_v37  ;;  %812 = vmatmul.msk.f32.gmra.mxu3 %vm86_vm0, %v73_v38 }
  0x4d   :  { %764 = vmatmul.msk.f32.gmra.mxu0 %vm86_vm0, %v25_v39  ;;  %780 = vmatmul.msk.f32.gmra.mxu1 %vm86_vm0, %v41_v40 }
  0x53   :  { %797 = vmatmul.msk.f32.gmra.mxu2 %vm86_vm0, %v58_v41  ;;  %813 = vmatmul.msk.f32.gmra.mxu3 %vm86_vm0, %v74_v42 }
  0x55   :  { %765 = vmatmul.msk.f32.gmra.mxu0 %vm86_vm0, %v26_v43  ;;  %781 = vmatmul.msk.f32.gmra.mxu1 %vm86_vm0, %v42_v44 }
  0x5b   :  { %798 = vmatmul.msk.f32.gmra.mxu2 %vm86_vm0, %v59_v45  ;;  %814 = vmatmul.msk.f32.gmra.mxu3 %vm86_vm0, %v75_v46 }
  0x5d   :  { %766 = vmatmul.msk.f32.gmra.mxu0 %vm86_vm0, %v27_v47  ;;  %782 = vmatmul.msk.f32.gmra.mxu1 %vm86_vm0, %v43_v48 }
  0x63   :  { %799 = vmatmul.msk.f32.gmra.mxu2 %vm86_vm0, %v60_v49  ;;  %815 = vmatmul.msk.f32.gmra.mxu3 %vm86_vm0, %v76_v50 }
  0x65   :  { %767 = vmatmul.msk.f32.gmra.mxu0 %vm86_vm0, %v28_v51  ;;  %783 = vmatmul.msk.f32.gmra.mxu1 %vm86_vm0, %v44_v52 }
  0x6b   :  { %800 = vmatmul.msk.f32.gmra.mxu2 %vm86_vm0, %v61_v53  ;;  %816 = vmatmul.msk.f32.gmra.mxu3 %vm86_vm0, %v77_v54 }
  0x6d   :  { %768 = vmatmul.msk.f32.gmra.mxu0 %vm86_vm0, %v29_v55  ;;  %784 = vmatmul.msk.f32.gmra.mxu1 %vm86_vm0, %v45_v56 }
  0x73   :  { %801 = vmatmul.msk.f32.gmra.mxu2 %vm86_vm0, %v62_v57  ;;  %817 = vmatmul.msk.f32.gmra.mxu3 %vm86_vm0, %v78_v58 }
  0x75   :  { %769 = vmatmul.msk.f32.gmra.mxu0 %vm86_vm0, %v30_v59  ;;  %785 = vmatmul.msk.f32.gmra.mxu1 %vm86_vm0, %v46_v60 }
  0x7b   :  { %802 = vmatmul.msk.f32.gmra.mxu2 %vm86_vm0, %v63_v61  ;;  %818 = vmatmul.msk.f32.gmra.mxu3 %vm86_vm0, %v79_v62 }
  0x7d   :  { %770 = vmatmul.msk.f32.gmra.mxu0 %vm86_vm0, %v31_v63  ;;  %786 = vmatmul.msk.f32.gmra.mxu1 %vm86_vm0, %v47_v0 }
  0x83   :  { %803 = vmatmul.msk.f32.gmra.mxu2 %vm86_vm0, %v64_v1  ;;  %819 = vmatmul.msk.f32.gmra.mxu3 %vm86_vm0, %v80_v2 }
  0x85   :  { %771 = vmatmul.msk.f32.gmra.mxu0 %vm86_vm0, %v32_v3  ;;  %787 = vmatmul.msk.f32.gmra.mxu1 %vm86_vm0, %v48_v4 }
  0x8a   :  { %v296_v7 = vpop.f32.mrf.mxu0  ;;  %v344_v8 = vpop.f32.mrf.mxu1 }
  0x8b   :  { %v492_v9 = vmul.f32 %v1136_v5, %v296_v7  ;;  %v508_v10 = vmul.f32 %v1136_v5, %v344_v8 }
  0x8d   :  { %v560_v11 = vadd.f32 %v1141_v6, %v492_v9  ;;  %v576_v12 = vadd.f32 %v1141_v6, %v508_v10 }
  0x8e   :  { %v392_v13 = vpop.f32.mrf.mxu2  ;;  %v440_v14 = vpop.f32.mrf.mxu3 }
  0x8f   :  { %v624_v15 = vmax.f32 %v560_v11, 0.0  ;;  %v640_v16 = vmax.f32 %v576_v12, 0.0  ;;  %v524_v17 = vmul.f32 %v1136_v5, %v392_v13  ;;  %v540_v18 = vmul.f32 %v1136_v5, %v440_v14 }
  0x91   :  { %688 = vst [vmem:[%s1467_s4] sm:$0xff] %v624_v15  ;;  %v592_v19 = vadd.f32 %v1141_v6, %v524_v17  ;;  %v608_v20 = vadd.f32 %v1141_v6, %v540_v18 }
  0x92   :  { %704 = vst [vmem:[%s1467_s4 + $0x80] sm:$0xff] %v640_v16  ;;  %v299_v21 = vpop.f32.mrf.mxu0  ;;  %v347_v22 = vpop.f32.mrf.mxu1 }
  0x93   :  { %v656_v23 = vmax.f32 %v592_v19, 0.0  ;;  %v672_v24 = vmax.f32 %v608_v20, 0.0  ;;  %v493_v25 = vmul.f32 %v1136_v5, %v299_v21  ;;  %v509_v26 = vmul.f32 %v1136_v5, %v347_v22 }
  0x95   :  { %720 = vst [vmem:[%s1467_s4 + $0x100] sm:$0xff] %v656_v23  ;;  %v561_v27 = vadd.f32 %v1141_v6, %v493_v25  ;;  %v577_v28 = vadd.f32 %v1141_v6, %v509_v26 }
  0x96   :  { %736 = vst [vmem:[%s1467_s4 + $0x180] sm:$0xff] %v672_v24  ;;  %v395_v29 = vpop.f32.mrf.mxu2  ;;  %v443_v30 = vpop.f32.mrf.mxu3 }
  0x97   :  { %v625_v31 = vmax.f32 %v561_v27, 0.0  ;;  %v641_v32 = vmax.f32 %v577_v28, 0.0  ;;  %v525_v33 = vmul.f32 %v1136_v5, %v395_v29  ;;  %v541_v34 = vmul.f32 %v1136_v5, %v443_v30 }
  0x99   :  { %689 = vst [vmem:[%s1467_s4 + $0x8] sm:$0xff] %v625_v31  ;;  %v593_v35 = vadd.f32 %v1141_v6, %v525_v33  ;;  %v609_v36 = vadd.f32 %v1141_v6, %v541_v34 }
  0x9a   :  { %705 = vst [vmem:[%s1467_s4 + $0x88] sm:$0xff] %v641_v32  ;;  %v302_v37 = vpop.f32.mrf.mxu0  ;;  %v350_v38 = vpop.f32.mrf.mxu1 }
  0x9b   :  { %v657_v39 = vmax.f32 %v593_v35, 0.0  ;;  %v673_v40 = vmax.f32 %v609_v36, 0.0  ;;  %v494_v41 = vmul.f32 %v1136_v5, %v302_v37  ;;  %v510_v42 = vmul.f32 %v1136_v5, %v350_v38 }
  0x9d   :  { %721 = vst [vmem:[%s1467_s4 + $0x108] sm:$0xff] %v657_v39  ;;  %v562_v43 = vadd.f32 %v1141_v6, %v494_v41  ;;  %v578_v44 = vadd.f32 %v1141_v6, %v510_v42 }
  0x9e   :  { %737 = vst [vmem:[%s1467_s4 + $0x188] sm:$0xff] %v673_v40  ;;  %v398_v45 = vpop.f32.mrf.mxu2  ;;  %v446_v46 = vpop.f32.mrf.mxu3 }
  0x9f   :  { %v626_v47 = vmax.f32 %v562_v43, 0.0  ;;  %v642_v48 = vmax.f32 %v578_v44, 0.0  ;;  %v526_v49 = vmul.f32 %v1136_v5, %v398_v45  ;;  %v542_v50 = vmul.f32 %v1136_v5, %v446_v46 }
  0xa1   :  { %690 = vst [vmem:[%s1467_s4 + $0x10] sm:$0xff] %v626_v47  ;;  %v594_v51 = vadd.f32 %v1141_v6, %v526_v49  ;;  %v610_v52 = vadd.f32 %v1141_v6, %v542_v50 }
  0xa2   :  { %706 = vst [vmem:[%s1467_s4 + $0x90] sm:$0xff] %v642_v48  ;;  %v305_v53 = vpop.f32.mrf.mxu0  ;;  %v353_v54 = vpop.f32.mrf.mxu1 }
  0xa3   :  { %v658_v55 = vmax.f32 %v594_v51, 0.0  ;;  %v674_v56 = vmax.f32 %v610_v52, 0.0  ;;  %v495_v57 = vmul.f32 %v1136_v5, %v305_v53  ;;  %v511_v58 = vmul.f32 %v1136_v5, %v353_v54 }
  0xa5   :  { %722 = vst [vmem:[%s1467_s4 + $0x110] sm:$0xff] %v658_v55  ;;  %v563_v59 = vadd.f32 %v1141_v6, %v495_v57  ;;  %v579_v60 = vadd.f32 %v1141_v6, %v511_v58 }
  0xa6   :  { %738 = vst [vmem:[%s1467_s4 + $0x190] sm:$0xff] %v674_v56  ;;  %v401_v61 = vpop.f32.mrf.mxu2  ;;  %v449_v62 = vpop.f32.mrf.mxu3 }
  0xa7   :  { %v627_v63 = vmax.f32 %v563_v59, 0.0  ;;  %v643_v0 = vmax.f32 %v579_v60, 0.0  ;;  %v527_v1 = vmul.f32 %v1136_v5, %v401_v61  ;;  %v543_v2 = vmul.f32 %v1136_v5, %v449_v62 }
  0xa9   :  { %691 = vst [vmem:[%s1467_s4 + $0x18] sm:$0xff] %v627_v63  ;;  %v595_v3 = vadd.f32 %v1141_v6, %v527_v1  ;;  %v611_v4 = vadd.f32 %v1141_v6, %v543_v2 }
  0xaa   :  { %707 = vst [vmem:[%s1467_s4 + $0x98] sm:$0xff] %v643_v0  ;;  %v308_v7 = vpop.f32.mrf.mxu0  ;;  %v356_v8 = vpop.f32.mrf.mxu1 }
  0xab   :  { %v659_v9 = vmax.f32 %v595_v3, 0.0  ;;  %v675_v10 = vmax.f32 %v611_v4, 0.0  ;;  %v496_v11 = vmul.f32 %v1136_v5, %v308_v7  ;;  %v512_v12 = vmul.f32 %v1136_v5, %v356_v8 }
  0xad   :  { %723 = vst [vmem:[%s1467_s4 + $0x118] sm:$0xff] %v659_v9  ;;  %v564_v13 = vadd.f32 %v1141_v6, %v496_v11  ;;  %v580_v14 = vadd.f32 %v1141_v6, %v512_v12 }
  0xae   :  { %739 = vst [vmem:[%s1467_s4 + $0x198] sm:$0xff] %v675_v10  ;;  %v404_v15 = vpop.f32.mrf.mxu2  ;;  %v452_v16 = vpop.f32.mrf.mxu3 }
  0xaf   :  { %v628_v17 = vmax.f32 %v564_v13, 0.0  ;;  %v644_v18 = vmax.f32 %v580_v14, 0.0  ;;  %v528_v19 = vmul.f32 %v1136_v5, %v404_v15  ;;  %v544_v20 = vmul.f32 %v1136_v5, %v452_v16 }
  0xb1   :  { %692 = vst [vmem:[%s1467_s4 + $0x20] sm:$0xff] %v628_v17  ;;  %v596_v21 = vadd.f32 %v1141_v6, %v528_v19  ;;  %v612_v22 = vadd.f32 %v1141_v6, %v544_v20 }
  0xb2   :  { %708 = vst [vmem:[%s1467_s4 + $0xa0] sm:$0xff] %v644_v18  ;;  %v311_v23 = vpop.f32.mrf.mxu0  ;;  %v359_v24 = vpop.f32.mrf.mxu1 }
  0xb3   :  { %v660_v25 = vmax.f32 %v596_v21, 0.0  ;;  %v676_v26 = vmax.f32 %v612_v22, 0.0  ;;  %v497_v27 = vmul.f32 %v1136_v5, %v311_v23  ;;  %v513_v28 = vmul.f32 %v1136_v5, %v359_v24 }
  0xb5   :  { %724 = vst [vmem:[%s1467_s4 + $0x120] sm:$0xff] %v660_v25  ;;  %v565_v29 = vadd.f32 %v1141_v6, %v497_v27  ;;  %v581_v30 = vadd.f32 %v1141_v6, %v513_v28 }
  0xb6   :  { %740 = vst [vmem:[%s1467_s4 + $0x1a0] sm:$0xff] %v676_v26  ;;  %v407_v31 = vpop.f32.mrf.mxu2  ;;  %v455_v32 = vpop.f32.mrf.mxu3 }
  0xb7   :  { %v629_v33 = vmax.f32 %v565_v29, 0.0  ;;  %v645_v34 = vmax.f32 %v581_v30, 0.0  ;;  %v529_v35 = vmul.f32 %v1136_v5, %v407_v31  ;;  %v545_v36 = vmul.f32 %v1136_v5, %v455_v32 }
  0xb9   :  { %693 = vst [vmem:[%s1467_s4 + $0x28] sm:$0xff] %v629_v33  ;;  %v597_v37 = vadd.f32 %v1141_v6, %v529_v35  ;;  %v613_v38 = vadd.f32 %v1141_v6, %v545_v36 }
  0xba   :  { %709 = vst [vmem:[%s1467_s4 + $0xa8] sm:$0xff] %v645_v34  ;;  %v314_v39 = vpop.f32.mrf.mxu0  ;;  %v362_v40 = vpop.f32.mrf.mxu1 }
  0xbb   :  { %v661_v41 = vmax.f32 %v597_v37, 0.0  ;;  %v677_v42 = vmax.f32 %v613_v38, 0.0  ;;  %v498_v43 = vmul.f32 %v1136_v5, %v314_v39  ;;  %v514_v44 = vmul.f32 %v1136_v5, %v362_v40 }
  0xbd   :  { %725 = vst [vmem:[%s1467_s4 + $0x128] sm:$0xff] %v661_v41  ;;  %v566_v45 = vadd.f32 %v1141_v6, %v498_v43  ;;  %v582_v46 = vadd.f32 %v1141_v6, %v514_v44 }
  0xbe   :  { %741 = vst [vmem:[%s1467_s4 + $0x1a8] sm:$0xff] %v677_v42  ;;  %v410_v47 = vpop.f32.mrf.mxu2  ;;  %v458_v48 = vpop.f32.mrf.mxu3 }
  0xbf   :  { %v630_v49 = vmax.f32 %v566_v45, 0.0  ;;  %v646_v50 = vmax.f32 %v582_v46, 0.0  ;;  %v530_v51 = vmul.f32 %v1136_v5, %v410_v47  ;;  %v546_v52 = vmul.f32 %v1136_v5, %v458_v48 }
  0xc1   :  { %694 = vst [vmem:[%s1467_s4 + $0x30] sm:$0xff] %v630_v49  ;;  %v598_v53 = vadd.f32 %v1141_v6, %v530_v51  ;;  %v614_v54 = vadd.f32 %v1141_v6, %v546_v52 }
  0xc2   :  { %710 = vst [vmem:[%s1467_s4 + $0xb0] sm:$0xff] %v646_v50  ;;  %v317_v55 = vpop.f32.mrf.mxu0  ;;  %v365_v56 = vpop.f32.mrf.mxu1 }
  0xc3   :  { %v662_v57 = vmax.f32 %v598_v53, 0.0  ;;  %v678_v58 = vmax.f32 %v614_v54, 0.0  ;;  %v499_v59 = vmul.f32 %v1136_v5, %v317_v55  ;;  %v515_v60 = vmul.f32 %v1136_v5, %v365_v56 }
  0xc5   :  { %726 = vst [vmem:[%s1467_s4 + $0x130] sm:$0xff] %v662_v57  ;;  %v567_v61 = vadd.f32 %v1141_v6, %v499_v59  ;;  %v583_v62 = vadd.f32 %v1141_v6, %v515_v60 }
  0xc6   :  { %742 = vst [vmem:[%s1467_s4 + $0x1b0] sm:$0xff] %v678_v58  ;;  %v413_v63 = vpop.f32.mrf.mxu2  ;;  %v461_v0 = vpop.f32.mrf.mxu3 }
  0xc7   :  { %v631_v1 = vmax.f32 %v567_v61, 0.0  ;;  %v647_v2 = vmax.f32 %v583_v62, 0.0  ;;  %v531_v3 = vmul.f32 %v1136_v5, %v413_v63  ;;  %v547_v4 = vmul.f32 %v1136_v5, %v461_v0 }
  0xc9   :  { %695 = vst [vmem:[%s1467_s4 + $0x38] sm:$0xff] %v631_v1  ;;  %v599_v7 = vadd.f32 %v1141_v6, %v531_v3  ;;  %v615_v8 = vadd.f32 %v1141_v6, %v547_v4 }
  0xca   :  { %711 = vst [vmem:[%s1467_s4 + $0xb8] sm:$0xff] %v647_v2  ;;  %v320_v9 = vpop.f32.mrf.mxu0  ;;  %v368_v10 = vpop.f32.mrf.mxu1 }
  0xcb   :  { %v663_v11 = vmax.f32 %v599_v7, 0.0  ;;  %v679_v12 = vmax.f32 %v615_v8, 0.0  ;;  %v500_v13 = vmul.f32 %v1136_v5, %v320_v9  ;;  %v516_v14 = vmul.f32 %v1136_v5, %v368_v10 }
  0xcd   :  { %727 = vst [vmem:[%s1467_s4 + $0x138] sm:$0xff] %v663_v11  ;;  %v568_v15 = vadd.f32 %v1141_v6, %v500_v13  ;;  %v584_v16 = vadd.f32 %v1141_v6, %v516_v14 }
  0xce   :  { %743 = vst [vmem:[%s1467_s4 + $0x1b8] sm:$0xff] %v679_v12  ;;  %v416_v17 = vpop.f32.mrf.mxu2  ;;  %v464_v18 = vpop.f32.mrf.mxu3 }
  0xcf   :  { %v632_v19 = vmax.f32 %v568_v15, 0.0  ;;  %v648_v20 = vmax.f32 %v584_v16, 0.0  ;;  %v532_v21 = vmul.f32 %v1136_v5, %v416_v17  ;;  %v548_v22 = vmul.f32 %v1136_v5, %v464_v18 }
  0xd1   :  { %696 = vst [vmem:[%s1467_s4 + $0x40] sm:$0xff] %v632_v19  ;;  %v600_v23 = vadd.f32 %v1141_v6, %v532_v21  ;;  %v616_v24 = vadd.f32 %v1141_v6, %v548_v22 }
  0xd2   :  { %712 = vst [vmem:[%s1467_s4 + $0xc0] sm:$0xff] %v648_v20  ;;  %v323_v25 = vpop.f32.mrf.mxu0  ;;  %v371_v26 = vpop.f32.mrf.mxu1 }
  0xd3   :  { %v664_v27 = vmax.f32 %v600_v23, 0.0  ;;  %v680_v28 = vmax.f32 %v616_v24, 0.0  ;;  %v501_v29 = vmul.f32 %v1136_v5, %v323_v25  ;;  %v517_v30 = vmul.f32 %v1136_v5, %v371_v26 }
  0xd5   :  { %728 = vst [vmem:[%s1467_s4 + $0x140] sm:$0xff] %v664_v27  ;;  %v569_v31 = vadd.f32 %v1141_v6, %v501_v29  ;;  %v585_v32 = vadd.f32 %v1141_v6, %v517_v30 }
  0xd6   :  { %744 = vst [vmem:[%s1467_s4 + $0x1c0] sm:$0xff] %v680_v28  ;;  %v419_v33 = vpop.f32.mrf.mxu2  ;;  %v467_v34 = vpop.f32.mrf.mxu3 }
  0xd7   :  { %v633_v35 = vmax.f32 %v569_v31, 0.0  ;;  %v649_v36 = vmax.f32 %v585_v32, 0.0  ;;  %v533_v37 = vmul.f32 %v1136_v5, %v419_v33  ;;  %v549_v38 = vmul.f32 %v1136_v5, %v467_v34 }
  0xd9   :  { %697 = vst [vmem:[%s1467_s4 + $0x48] sm:$0xff] %v633_v35  ;;  %v601_v39 = vadd.f32 %v1141_v6, %v533_v37  ;;  %v617_v40 = vadd.f32 %v1141_v6, %v549_v38 }
  0xda   :  { %713 = vst [vmem:[%s1467_s4 + $0xc8] sm:$0xff] %v649_v36  ;;  %v326_v41 = vpop.f32.mrf.mxu0  ;;  %v374_v42 = vpop.f32.mrf.mxu1 }
  0xdb   :  { %v665_v43 = vmax.f32 %v601_v39, 0.0  ;;  %v681_v44 = vmax.f32 %v617_v40, 0.0  ;;  %v502_v45 = vmul.f32 %v1136_v5, %v326_v41  ;;  %v518_v46 = vmul.f32 %v1136_v5, %v374_v42 }
  0xdd   :  { %729 = vst [vmem:[%s1467_s4 + $0x148] sm:$0xff] %v665_v43  ;;  %v570_v47 = vadd.f32 %v1141_v6, %v502_v45  ;;  %v586_v48 = vadd.f32 %v1141_v6, %v518_v46 }
  0xde   :  { %745 = vst [vmem:[%s1467_s4 + $0x1c8] sm:$0xff] %v681_v44  ;;  %v422_v49 = vpop.f32.mrf.mxu2  ;;  %v470_v50 = vpop.f32.mrf.mxu3 }
  0xdf   :  { %v634_v51 = vmax.f32 %v570_v47, 0.0  ;;  %v650_v52 = vmax.f32 %v586_v48, 0.0  ;;  %v534_v53 = vmul.f32 %v1136_v5, %v422_v49  ;;  %v550_v54 = vmul.f32 %v1136_v5, %v470_v50 }
  0xe1   :  { %698 = vst [vmem:[%s1467_s4 + $0x50] sm:$0xff] %v634_v51  ;;  %v602_v55 = vadd.f32 %v1141_v6, %v534_v53  ;;  %v618_v56 = vadd.f32 %v1141_v6, %v550_v54 }
  0xe2   :  { %714 = vst [vmem:[%s1467_s4 + $0xd0] sm:$0xff] %v650_v52  ;;  %v329_v57 = vpop.f32.mrf.mxu0  ;;  %v377_v58 = vpop.f32.mrf.mxu1 }
  0xe3   :  { %v666_v59 = vmax.f32 %v602_v55, 0.0  ;;  %v682_v60 = vmax.f32 %v618_v56, 0.0  ;;  %v503_v61 = vmul.f32 %v1136_v5, %v329_v57  ;;  %v519_v62 = vmul.f32 %v1136_v5, %v377_v58 }
  0xe5   :  { %730 = vst [vmem:[%s1467_s4 + $0x150] sm:$0xff] %v666_v59  ;;  %v571_v63 = vadd.f32 %v1141_v6, %v503_v61  ;;  %v587_v0 = vadd.f32 %v1141_v6, %v519_v62 }
  0xe6   :  { %746 = vst [vmem:[%s1467_s4 + $0x1d0] sm:$0xff] %v682_v60  ;;  %v425_v1 = vpop.f32.mrf.mxu2  ;;  %v473_v2 = vpop.f32.mrf.mxu3 }
  0xe7   :  { %v635_v3 = vmax.f32 %v571_v63, 0.0  ;;  %v651_v4 = vmax.f32 %v587_v0, 0.0  ;;  %v535_v7 = vmul.f32 %v1136_v5, %v425_v1  ;;  %v551_v8 = vmul.f32 %v1136_v5, %v473_v2 }
  0xe9   :  { %699 = vst [vmem:[%s1467_s4 + $0x58] sm:$0xff] %v635_v3  ;;  %v603_v9 = vadd.f32 %v1141_v6, %v535_v7  ;;  %v619_v10 = vadd.f32 %v1141_v6, %v551_v8 }
  0xea   :  { %715 = vst [vmem:[%s1467_s4 + $0xd8] sm:$0xff] %v651_v4  ;;  %v332_v11 = vpop.f32.mrf.mxu0  ;;  %v380_v12 = vpop.f32.mrf.mxu1 }
  0xeb   :  { %v667_v13 = vmax.f32 %v603_v9, 0.0  ;;  %v683_v14 = vmax.f32 %v619_v10, 0.0  ;;  %v504_v15 = vmul.f32 %v1136_v5, %v332_v11  ;;  %v520_v16 = vmul.f32 %v1136_v5, %v380_v12 }
  0xed   :  { %731 = vst [vmem:[%s1467_s4 + $0x158] sm:$0xff] %v667_v13  ;;  %v572_v17 = vadd.f32 %v1141_v6, %v504_v15  ;;  %v588_v18 = vadd.f32 %v1141_v6, %v520_v16 }
  0xee   :  { %747 = vst [vmem:[%s1467_s4 + $0x1d8] sm:$0xff] %v683_v14  ;;  %v428_v19 = vpop.f32.mrf.mxu2  ;;  %v476_v20 = vpop.f32.mrf.mxu3 }
  0xef   :  { %v636_v21 = vmax.f32 %v572_v17, 0.0  ;;  %v652_v22 = vmax.f32 %v588_v18, 0.0  ;;  %v536_v23 = vmul.f32 %v1136_v5, %v428_v19  ;;  %v552_v24 = vmul.f32 %v1136_v5, %v476_v20 }
  0xf1   :  { %700 = vst [vmem:[%s1467_s4 + $0x60] sm:$0xff] %v636_v21  ;;  %v604_v25 = vadd.f32 %v1141_v6, %v536_v23  ;;  %v620_v26 = vadd.f32 %v1141_v6, %v552_v24 }
  0xf2   :  { %716 = vst [vmem:[%s1467_s4 + $0xe0] sm:$0xff] %v652_v22  ;;  %v335_v27 = vpop.f32.mrf.mxu0  ;;  %v383_v28 = vpop.f32.mrf.mxu1 }
  0xf3   :  { %v668_v29 = vmax.f32 %v604_v25, 0.0  ;;  %v684_v30 = vmax.f32 %v620_v26, 0.0  ;;  %v505_v31 = vmul.f32 %v1136_v5, %v335_v27  ;;  %v521_v32 = vmul.f32 %v1136_v5, %v383_v28 }
  0xf5   :  { %732 = vst [vmem:[%s1467_s4 + $0x160] sm:$0xff] %v668_v29  ;;  %v573_v33 = vadd.f32 %v1141_v6, %v505_v31  ;;  %v589_v34 = vadd.f32 %v1141_v6, %v521_v32 }
  0xf6   :  { %748 = vst [vmem:[%s1467_s4 + $0x1e0] sm:$0xff] %v684_v30  ;;  %v431_v35 = vpop.f32.mrf.mxu2  ;;  %v479_v36 = vpop.f32.mrf.mxu3 }
  0xf7   :  { %v637_v37 = vmax.f32 %v573_v33, 0.0  ;;  %v653_v38 = vmax.f32 %v589_v34, 0.0  ;;  %v537_v39 = vmul.f32 %v1136_v5, %v431_v35  ;;  %v553_v40 = vmul.f32 %v1136_v5, %v479_v36 }
  0xf9   :  { %701 = vst [vmem:[%s1467_s4 + $0x68] sm:$0xff] %v637_v37  ;;  %v605_v41 = vadd.f32 %v1141_v6, %v537_v39  ;;  %v621_v42 = vadd.f32 %v1141_v6, %v553_v40 }
  0xfa   :  { %717 = vst [vmem:[%s1467_s4 + $0xe8] sm:$0xff] %v653_v38  ;;  %v338_v43 = vpop.f32.mrf.mxu0  ;;  %v386_v44 = vpop.f32.mrf.mxu1 }
  0xfb   :  { %v669_v45 = vmax.f32 %v605_v41, 0.0  ;;  %v685_v46 = vmax.f32 %v621_v42, 0.0  ;;  %v506_v47 = vmul.f32 %v1136_v5, %v338_v43  ;;  %v522_v48 = vmul.f32 %v1136_v5, %v386_v44 }
  0xfd   :  { %733 = vst [vmem:[%s1467_s4 + $0x168] sm:$0xff] %v669_v45  ;;  %v574_v49 = vadd.f32 %v1141_v6, %v506_v47  ;;  %v590_v50 = vadd.f32 %v1141_v6, %v522_v48 }
  0xfe   :  { %749 = vst [vmem:[%s1467_s4 + $0x1e8] sm:$0xff] %v685_v46  ;;  %v434_v51 = vpop.f32.mrf.mxu2  ;;  %v482_v52 = vpop.f32.mrf.mxu3 }
  0xff   :  { %v638_v53 = vmax.f32 %v574_v49, 0.0  ;;  %v654_v54 = vmax.f32 %v590_v50, 0.0  ;;  %v538_v55 = vmul.f32 %v1136_v5, %v434_v51  ;;  %v554_v56 = vmul.f32 %v1136_v5, %v482_v52 }
 0x101   :  { %702 = vst [vmem:[%s1467_s4 + $0x70] sm:$0xff] %v638_v53  ;;  %v606_v57 = vadd.f32 %v1141_v6, %v538_v55  ;;  %v622_v58 = vadd.f32 %v1141_v6, %v554_v56 }
 0x102   :  { %718 = vst [vmem:[%s1467_s4 + $0xf0] sm:$0xff] %v654_v54  ;;  %v341_v59 = vpop.f32.mrf.mxu0  ;;  %v389_v60 = vpop.f32.mrf.mxu1 }
 0x103   :  { %v670_v61 = vmax.f32 %v606_v57, 0.0  ;;  %v686_v62 = vmax.f32 %v622_v58, 0.0  ;;  %v507_v63 = vmul.f32 %v1136_v5, %v341_v59  ;;  %v523_v0 = vmul.f32 %v1136_v5, %v389_v60 }
 0x105   :  { %734 = vst [vmem:[%s1467_s4 + $0x170] sm:$0xff] %v670_v61  ;;  %v575_v1 = vadd.f32 %v1141_v6, %v507_v63  ;;  %v591_v2 = vadd.f32 %v1141_v6, %v523_v0 }
 0x106   :  { %750 = vst [vmem:[%s1467_s4 + $0x1f0] sm:$0xff] %v686_v62  ;;  %v437_v3 = vpop.f32.mrf.mxu2  ;;  %v485_v4 = vpop.f32.mrf.mxu3 }
 0x107   :  { %v639_v7 = vmax.f32 %v575_v1, 0.0  ;;  %v655_v8 = vmax.f32 %v591_v2, 0.0  ;;  %v539_v9 = vmul.f32 %v1136_v5, %v437_v3  ;;  %v555_v10 = vmul.f32 %v1136_v5, %v485_v4 }
 0x109   :  { %703 = vst [vmem:[%s1467_s4 + $0x78] sm:$0xff] %v639_v7  ;;  %v607_v11 = vadd.f32 %v1141_v6, %v539_v9  ;;  %v623_v12 = vadd.f32 %v1141_v6, %v555_v10 }
 0x10a   :  { %719 = vst [vmem:[%s1467_s4 + $0xf8] sm:$0xff] %v655_v8 }
 0x10b   :  { %v671_v13 = vmax.f32 %v607_v11, 0.0  ;;  %v687_v14 = vmax.f32 %v623_v12, 0.0 }
 0x10d   :  { %735 = vst [vmem:[%s1467_s4 + $0x178] sm:$0xff] %v671_v13 }
 0x10e   :  { %751 = vst [vmem:[%s1467_s4 + $0x1f8] sm:$0xff] %v687_v14 }

// kernel: _lambda_.2
= control target key start
LH: loop header
LB: loop body
LE: loop exit
PB: predicated region body
PF: predicated region fallthrough
CT: control target
= control target key end

     0   :  { %vm110_vm0 = vcmask 326656   ;;  %s1304_s1 = inlined_call_operand.vmem [shape: f32[40,128], index: 1, kind: input, shape index: {}]   ;;  %s1305_s0 = inlined_call_operand.vmem [shape: f32[512,40], index: 0, kind: input, shape index: {}]   ;;  %s1306_s2 = inlined_call_operand.vmem [shape: f32[1,1,128], index: 2, kind: output, shape index: {0}]   ;;  %s1307_s3 = inlined_call_operand.vmem [shape: f32[1,1,128], index: 3, kind: output, shape index: {1}]  }
   0x1   :  { %v109_v0 = vld [vmem:[%s1304_s1 + $0x20] sm:$0xff]  ;;  %v108_v1 = vld [vmem:[%s1304_s1 + $0x18] sm:$0xff]  ;;  %v107_v2 = vld [vmem:[%s1304_s1 + $0x10] sm:$0xff] }
   0x2   :  { %314 = vmatpush.msra.mxu0 %v109_v0  ;;  %798 = vmatpush.msra.mxu1 %v109_v0  ;;  %v106_v3 = vld [vmem:[%s1304_s1 + $0x8] sm:$0xff]  ;;  %v105_v4 = vld [vmem:[%s1304_s1] sm:$0xff]  ;;  %v43_v9 = vld [vmem:[%s1305_s0 + $0x10] sm:$0xff] }
   0x3   :  { %799 = vmatpush.msra.mxu2 %v109_v0  ;;  %800 = vmatpush.msra.mxu3 %v109_v0  ;;  %v41_v5 = vld [vmem:[%s1305_s0] sm:$0xff]  ;;  %v42_v7 = vld [vmem:[%s1305_s0 + $0x8] sm:$0xff]  ;;  %v59_v10 = vld [vmem:[%s1305_s0 + $0x90] sm:$0xff] }
   0x4   :  { %315 = vmatpush.msra.mxu0 %v108_v1  ;;  %801 = vmatpush.msra.mxu1 %v108_v1  ;;  %v57_v6 = vld [vmem:[%s1305_s0 + $0x80] sm:$0xff]  ;;  %v58_v8 = vld [vmem:[%s1305_s0 + $0x88] sm:$0xff]  ;;  %v44_v11 = vld [vmem:[%s1305_s0 + $0x18] sm:$0xff] }
   0x5   :  { %802 = vmatpush.msra.mxu2 %v108_v1  ;;  %803 = vmatpush.msra.mxu3 %v108_v1  ;;  %v60_v12 = vld [vmem:[%s1305_s0 + $0x98] sm:$0xff]  ;;  %v73_v13 = vld [vmem:[%s1305_s0 + $0x100] sm:$0xff]  ;;  %v74_v16 = vld [vmem:[%s1305_s0 + $0x108] sm:$0xff] }
   0x6   :  { %316 = vmatpush.msra.mxu0 %v107_v2  ;;  %804 = vmatpush.msra.mxu1 %v107_v2  ;;  %v45_v14 = vld [vmem:[%s1305_s0 + $0x20] sm:$0xff]  ;;  %v46_v17 = vld [vmem:[%s1305_s0 + $0x28] sm:$0xff]  ;;  %v75_v19 = vld [vmem:[%s1305_s0 + $0x110] sm:$0xff] }
   0x7   :  { %805 = vmatpush.msra.mxu2 %v107_v2  ;;  %806 = vmatpush.msra.mxu3 %v107_v2  ;;  %v61_v15 = vld [vmem:[%s1305_s0 + $0xa0] sm:$0xff]  ;;  %v62_v18 = vld [vmem:[%s1305_s0 + $0xa8] sm:$0xff]  ;;  %v47_v20 = vld [vmem:[%s1305_s0 + $0x30] sm:$0xff] }
   0x8   :  { %317 = vmatpush.msra.mxu0 %v106_v3  ;;  %807 = vmatpush.msra.mxu1 %v106_v3  ;;  %v63_v21 = vld [vmem:[%s1305_s0 + $0xb0] sm:$0xff]  ;;  %v76_v22 = vld [vmem:[%s1305_s0 + $0x118] sm:$0xff]  ;;  %v77_v25 = vld [vmem:[%s1305_s0 + $0x120] sm:$0xff] }
   0x9   :  { %808 = vmatpush.msra.mxu2 %v106_v3  ;;  %809 = vmatpush.msra.mxu3 %v106_v3  ;;  %v48_v23 = vld [vmem:[%s1305_s0 + $0x38] sm:$0xff]  ;;  %v89_v26 = vld [vmem:[%s1305_s0 + $0x180] sm:$0xff]  ;;  %v78_v29 = vld [vmem:[%s1305_s0 + $0x128] sm:$0xff] }
   0xa   :  { %318 = vmatpush.msra.mxu0 %v105_v4  ;;  %810 = vmatpush.msra.mxu1 %v105_v4  ;;  %v64_v24 = vld [vmem:[%s1305_s0 + $0xb8] sm:$0xff]  ;;  %v49_v27 = vld [vmem:[%s1305_s0 + $0x40] sm:$0xff]  ;;  %v90_v30 = vld [vmem:[%s1305_s0 + $0x188] sm:$0xff] }
   0xb   :  { %734 = vmatmul.msk.f32.vlgmr.msra.gmra.mxu0 %vm110_vm0, %v41_v5  ;;  %750 = vmatmul.msk.f32.vlgmr.msra.gmra.mxu1 %vm110_vm0, %v57_v6  ;;  %v65_v28 = vld [vmem:[%s1305_s0 + $0xc0] sm:$0xff]  ;;  %v50_v31 = vld [vmem:[%s1305_s0 + $0x48] sm:$0xff]  ;;  %v79_v33 = vld [vmem:[%s1305_s0 + $0x130] sm:$0xff] }
   0xc   :  { %811 = vmatpush.msra.mxu2 %v105_v4  ;;  %812 = vmatpush.msra.mxu3 %v105_v4  ;;  %v66_v32 = vld [vmem:[%s1305_s0 + $0xc8] sm:$0xff]  ;;  %v91_v34 = vld [vmem:[%s1305_s0 + $0x190] sm:$0xff]  ;;  %v80_v37 = vld [vmem:[%s1305_s0 + $0x138] sm:$0xff] }
   0xd   :  { %766 = vmatmul.msk.f32.vlgmr.msra.gmra.mxu2 %vm110_vm0, %v73_v13  ;;  %782 = vmatmul.msk.f32.vlgmr.msra.gmra.mxu3 %vm110_vm0, %v89_v26  ;;  %v51_v35 = vld [vmem:[%s1305_s0 + $0x50] sm:$0xff]  ;;  %v92_v38 = vld [vmem:[%s1305_s0 + $0x198] sm:$0xff]  ;;  %v81_v41 = vld [vmem:[%s1305_s0 + $0x140] sm:$0xff] }
   0xe   :  { %v67_v36 = vld [vmem:[%s1305_s0 + $0xd0] sm:$0xff]  ;;  %v52_v39 = vld [vmem:[%s1305_s0 + $0x58] sm:$0xff]  ;;  %v93_v42 = vld [vmem:[%s1305_s0 + $0x1a0] sm:$0xff] }
   0xf   :  { %v68_v40 = vld [vmem:[%s1305_s0 + $0xd8] sm:$0xff]  ;;  %v53_v43 = vld [vmem:[%s1305_s0 + $0x60] sm:$0xff]  ;;  %v82_v45 = vld [vmem:[%s1305_s0 + $0x148] sm:$0xff] }
  0x10   :  { %v69_v44 = vld [vmem:[%s1305_s0 + $0xe0] sm:$0xff]  ;;  %v94_v46 = vld [vmem:[%s1305_s0 + $0x1a8] sm:$0xff]  ;;  %v83_v49 = vld [vmem:[%s1305_s0 + $0x150] sm:$0xff] }
  0x11   :  { %v54_v47 = vld [vmem:[%s1305_s0 + $0x68] sm:$0xff]  ;;  %v95_v50 = vld [vmem:[%s1305_s0 + $0x1b0] sm:$0xff]  ;;  %v84_v53 = vld [vmem:[%s1305_s0 + $0x158] sm:$0xff] }
  0x12   :  { %v70_v48 = vld [vmem:[%s1305_s0 + $0xe8] sm:$0xff]  ;;  %v55_v51 = vld [vmem:[%s1305_s0 + $0x70] sm:$0xff]  ;;  %v96_v54 = vld [vmem:[%s1305_s0 + $0x1b8] sm:$0xff] }
  0x13   :  { %735 = vmatmul.msk.f32.gmra.mxu0 %vm110_vm0, %v42_v7  ;;  %751 = vmatmul.msk.f32.gmra.mxu1 %vm110_vm0, %v58_v8  ;;  %v71_v52 = vld [vmem:[%s1305_s0 + $0xf0] sm:$0xff]  ;;  %v56_v55 = vld [vmem:[%s1305_s0 + $0x78] sm:$0xff]  ;;  %v85_v57 = vld [vmem:[%s1305_s0 + $0x160] sm:$0xff] }
  0x14   :  { %v72_v56 = vld [vmem:[%s1305_s0 + $0xf8] sm:$0xff]  ;;  %v97_v58 = vld [vmem:[%s1305_s0 + $0x1c0] sm:$0xff]  ;;  %v86_v61 = vld [vmem:[%s1305_s0 + $0x168] sm:$0xff] }
  0x15   :  { %767 = vmatmul.msk.f32.gmra.mxu2 %vm110_vm0, %v74_v16  ;;  %783 = vmatmul.msk.f32.gmra.mxu3 %vm110_vm0, %v90_v30  ;;  %v98_v62 = vld [vmem:[%s1305_s0 + $0x1c8] sm:$0xff]  ;;  %v87_v5 = vld [vmem:[%s1305_s0 + $0x170] sm:$0xff]  ;;  %v100_v13 = vld [vmem:[%s1305_s0 + $0x1d8] sm:$0xff] }
  0x16   :  { %v99_v6 = vld [vmem:[%s1305_s0 + $0x1d0] sm:$0xff] }
  0x1b   :  { %736 = vmatmul.msk.f32.gmra.mxu0 %vm110_vm0, %v43_v9  ;;  %752 = vmatmul.msk.f32.gmra.mxu1 %vm110_vm0, %v59_v10 }
  0x1d   :  { %768 = vmatmul.msk.f32.gmra.mxu2 %vm110_vm0, %v75_v19  ;;  %784 = vmatmul.msk.f32.gmra.mxu3 %vm110_vm0, %v91_v34 }
  0x23   :  { %737 = vmatmul.msk.f32.gmra.mxu0 %vm110_vm0, %v44_v11  ;;  %753 = vmatmul.msk.f32.gmra.mxu1 %vm110_vm0, %v60_v12  ;;  %v88_v12 = vld [vmem:[%s1305_s0 + $0x178] sm:$0xff] }
  0x25   :  { %769 = vmatmul.msk.f32.gmra.mxu2 %vm110_vm0, %v76_v22  ;;  %785 = vmatmul.msk.f32.gmra.mxu3 %vm110_vm0, %v92_v38 }
  0x2b   :  { %738 = vmatmul.msk.f32.gmra.mxu0 %vm110_vm0, %v45_v14  ;;  %754 = vmatmul.msk.f32.gmra.mxu1 %vm110_vm0, %v61_v15 }
  0x2d   :  { %770 = vmatmul.msk.f32.gmra.mxu2 %vm110_vm0, %v77_v25  ;;  %786 = vmatmul.msk.f32.gmra.mxu3 %vm110_vm0, %v93_v42  ;;  %v102_v25 = vld [vmem:[%s1305_s0 + $0x1e8] sm:$0xff] }
  0x33   :  { %739 = vmatmul.msk.f32.gmra.mxu0 %vm110_vm0, %v46_v17  ;;  %755 = vmatmul.msk.f32.gmra.mxu1 %vm110_vm0, %v62_v18  ;;  %v101_v18 = vld [vmem:[%s1305_s0 + $0x1e0] sm:$0xff] }
  0x35   :  { %771 = vmatmul.msk.f32.gmra.mxu2 %vm110_vm0, %v78_v29  ;;  %787 = vmatmul.msk.f32.gmra.mxu3 %vm110_vm0, %v94_v46  ;;  %v103_v29 = vld [vmem:[%s1305_s0 + $0x1f0] sm:$0xff] }
  0x3b   :  { %740 = vmatmul.msk.f32.gmra.mxu0 %vm110_vm0, %v47_v20  ;;  %756 = vmatmul.msk.f32.gmra.mxu1 %vm110_vm0, %v63_v21 }
  0x3d   :  { %772 = vmatmul.msk.f32.gmra.mxu2 %vm110_vm0, %v79_v33  ;;  %788 = vmatmul.msk.f32.gmra.mxu3 %vm110_vm0, %v95_v50  ;;  %v104_v33 = vld [vmem:[%s1305_s0 + $0x1f8] sm:$0xff] }
  0x43   :  { %741 = vmatmul.msk.f32.gmra.mxu0 %vm110_vm0, %v48_v23  ;;  %757 = vmatmul.msk.f32.gmra.mxu1 %vm110_vm0, %v64_v24 }
  0x45   :  { %773 = vmatmul.msk.f32.gmra.mxu2 %vm110_vm0, %v80_v37  ;;  %789 = vmatmul.msk.f32.gmra.mxu3 %vm110_vm0, %v96_v54 }
  0x4b   :  { %742 = vmatmul.msk.f32.gmra.mxu0 %vm110_vm0, %v49_v27  ;;  %758 = vmatmul.msk.f32.gmra.mxu1 %vm110_vm0, %v65_v28 }
  0x4d   :  { %774 = vmatmul.msk.f32.gmra.mxu2 %vm110_vm0, %v81_v41  ;;  %790 = vmatmul.msk.f32.gmra.mxu3 %vm110_vm0, %v97_v58 }
  0x53   :  { %743 = vmatmul.msk.f32.gmra.mxu0 %vm110_vm0, %v50_v31  ;;  %759 = vmatmul.msk.f32.gmra.mxu1 %vm110_vm0, %v66_v32 }
  0x55   :  { %775 = vmatmul.msk.f32.gmra.mxu2 %vm110_vm0, %v82_v45  ;;  %791 = vmatmul.msk.f32.gmra.mxu3 %vm110_vm0, %v98_v62 }
  0x5b   :  { %744 = vmatmul.msk.f32.gmra.mxu0 %vm110_vm0, %v51_v35  ;;  %760 = vmatmul.msk.f32.gmra.mxu1 %vm110_vm0, %v67_v36 }
  0x5d   :  { %776 = vmatmul.msk.f32.gmra.mxu2 %vm110_vm0, %v83_v49  ;;  %792 = vmatmul.msk.f32.gmra.mxu3 %vm110_vm0, %v99_v6 }
  0x63   :  { %745 = vmatmul.msk.f32.gmra.mxu0 %vm110_vm0, %v52_v39  ;;  %761 = vmatmul.msk.f32.gmra.mxu1 %vm110_vm0, %v68_v40 }
  0x65   :  { %777 = vmatmul.msk.f32.gmra.mxu2 %vm110_vm0, %v84_v53  ;;  %793 = vmatmul.msk.f32.gmra.mxu3 %vm110_vm0, %v100_v13 }
  0x6b   :  { %746 = vmatmul.msk.f32.gmra.mxu0 %vm110_vm0, %v53_v43  ;;  %762 = vmatmul.msk.f32.gmra.mxu1 %vm110_vm0, %v69_v44 }
  0x6d   :  { %778 = vmatmul.msk.f32.gmra.mxu2 %vm110_vm0, %v85_v57  ;;  %794 = vmatmul.msk.f32.gmra.mxu3 %vm110_vm0, %v101_v18 }
  0x73   :  { %747 = vmatmul.msk.f32.gmra.mxu0 %vm110_vm0, %v54_v47  ;;  %763 = vmatmul.msk.f32.gmra.mxu1 %vm110_vm0, %v70_v48 }
  0x75   :  { %779 = vmatmul.msk.f32.gmra.mxu2 %vm110_vm0, %v86_v61  ;;  %795 = vmatmul.msk.f32.gmra.mxu3 %vm110_vm0, %v102_v25 }
  0x7b   :  { %748 = vmatmul.msk.f32.gmra.mxu0 %vm110_vm0, %v55_v51  ;;  %764 = vmatmul.msk.f32.gmra.mxu1 %vm110_vm0, %v71_v52 }
  0x7d   :  { %780 = vmatmul.msk.f32.gmra.mxu2 %vm110_vm0, %v87_v5  ;;  %796 = vmatmul.msk.f32.gmra.mxu3 %vm110_vm0, %v103_v29 }
  0x83   :  { %749 = vmatmul.msk.f32.gmra.mxu0 %vm110_vm0, %v56_v55  ;;  %765 = vmatmul.msk.f32.gmra.mxu1 %vm110_vm0, %v72_v56 }
  0x85   :  { %781 = vmatmul.msk.f32.gmra.mxu2 %vm110_vm0, %v88_v12  ;;  %797 = vmatmul.msk.f32.gmra.mxu3 %vm110_vm0, %v104_v33 }
  0x88   :  { %v320_v59 = vpop.f32.mrf.mxu0  ;;  %v1066_v60 = vpop.f32.mrf.mxu1 }
  0x89   :  { %v585_v1 = vmul.f32 %v320_v59, %v320_v59 }
  0x90   :  { %v323_v63 = vpop.f32.mrf.mxu0  ;;  %v1076_v0 = vpop.f32.mrf.mxu1 }
  0x91   :  { %v513_v2 = vadd.f32 %v323_v63, %v320_v59  ;;  %v586_v3 = vmul.f32 %v323_v63, %v323_v63  ;;  %v1102_v23 = vpop.f32.mrf.mxu2  ;;  %v1128_v38 = vpop.f32.mrf.mxu3 }
  0x93   :  { %v649_v4 = vadd.f32 %v586_v3, %v585_v1 }
  0x98   :  { %v326_v7 = vpop.f32.mrf.mxu0  ;;  %v1086_v10 = vpop.f32.mrf.mxu1 }
  0x99   :  { %v514_v8 = vadd.f32 %v513_v2, %v326_v7  ;;  %v587_v9 = vmul.f32 %v326_v7, %v326_v7  ;;  %v1110_v28 = vpop.f32.mrf.mxu2  ;;  %v1134_v42 = vpop.f32.mrf.mxu3 }
  0x9b   :  { %v650_v11 = vadd.f32 %v649_v4, %v587_v9 }
  0xa0   :  { %v329_v14 = vpop.f32.mrf.mxu0  ;;  %v1099_v19 = vpop.f32.mrf.mxu1 }
  0xa1   :  { %v515_v15 = vadd.f32 %v514_v8, %v329_v14  ;;  %v588_v16 = vmul.f32 %v329_v14, %v329_v14  ;;  %v1118_v32 = vpop.f32.mrf.mxu2  ;;  %v1140_v46 = vpop.f32.mrf.mxu3 }
  0xa3   :  { %v651_v17 = vadd.f32 %v650_v11, %v588_v16 }
  0xa8   :  { %v332_v20 = vpop.f32.mrf.mxu0  ;;  %v1108_v26 = vpop.f32.mrf.mxu1 }
  0xa9   :  { %v516_v21 = vadd.f32 %v515_v15, %v332_v20  ;;  %v589_v22 = vmul.f32 %v332_v20, %v332_v20  ;;  %v1126_v36 = vpop.f32.mrf.mxu2  ;;  %v1146_v50 = vpop.f32.mrf.mxu3 }
  0xab   :  { %v652_v24 = vadd.f32 %v651_v17, %v589_v22 }
  0xb0   :  { %v335_v27 = vpop.f32.mrf.mxu0  ;;  %v1116_v31 = vpop.f32.mrf.mxu1 }
  0xb1   :  { %v1132_v40 = vpop.f32.mrf.mxu2  ;;  %v590_v53 = vmul.f32 %v335_v27, %v335_v27  ;;  %v517_v55 = vadd.f32 %v516_v21, %v335_v27  ;;  %v1152_v57 = vpop.f32.mrf.mxu3 }
  0xb3   :  { %v653_v58 = vadd.f32 %v652_v24, %v590_v53 }
  0xb8   :  { %v338_v30 = vpop.f32.mrf.mxu0  ;;  %v1124_v35 = vpop.f32.mrf.mxu1 }
  0xb9   :  { %v1138_v45 = vpop.f32.mrf.mxu2  ;;  %v591_v56 = vmul.f32 %v338_v30, %v338_v30  ;;  %v518_v59 = vadd.f32 %v517_v55, %v338_v30  ;;  %v1158_v16 = vpop.f32.mrf.mxu3 }
  0xbb   :  { %v654_v63 = vadd.f32 %v653_v58, %v591_v56 }
  0xc0   :  { %v341_v34 = vpop.f32.mrf.mxu0  ;;  %v1130_v39 = vpop.f32.mrf.mxu1 }
  0xc1   :  { %v1144_v49 = vpop.f32.mrf.mxu2  ;;  %v592_v61 = vmul.f32 %v341_v34, %v341_v34  ;;  %v519_v1 = vadd.f32 %v518_v59, %v341_v34  ;;  %v1162_v56 = vpop.f32.mrf.mxu3  ;;  %v602_v59 = vmul.f32 %v1076_v0, %v1076_v0 }
  0xc3   :  { %v655_v3 = vadd.f32 %v654_v63, %v592_v61  ;;  %v603_v63 = vmul.f32 %v1086_v10, %v1086_v10 }
  0xc8   :  { %v344_v37 = vpop.f32.mrf.mxu0  ;;  %v1136_v43 = vpop.f32.mrf.mxu1 }
  0xc9   :  { %v1150_v54 = vpop.f32.mrf.mxu2  ;;  %v593_v2 = vmul.f32 %v344_v37, %v344_v37  ;;  %v520_v4 = vadd.f32 %v519_v1, %v344_v37 }
  0xcb   :  { %v656_v7 = vadd.f32 %v655_v3, %v593_v2 }
  0xd0   :  { %v347_v41 = vpop.f32.mrf.mxu0  ;;  %v1142_v48 = vpop.f32.mrf.mxu1 }
  0xd1   :  { %v594_v5 = vmul.f32 %v347_v41, %v347_v41  ;;  %v521_v8 = vadd.f32 %v520_v4, %v347_v41  ;;  %v1156_v11 = vpop.f32.mrf.mxu2  ;;  %v604_v4 = vmul.f32 %v1099_v19, %v1099_v19 }
  0xd3   :  { %v657_v12 = vadd.f32 %v656_v7, %v594_v5 }
  0xd8   :  { %v350_v44 = vpop.f32.mrf.mxu0  ;;  %v1148_v52 = vpop.f32.mrf.mxu1 }
  0xd9   :  { %v595_v9 = vmul.f32 %v350_v44, %v350_v44  ;;  %v522_v13 = vadd.f32 %v521_v8, %v350_v44  ;;  %v1160_v41 = vpop.f32.mrf.mxu2  ;;  %v605_v8 = vmul.f32 %v1108_v26, %v1108_v26 }
  0xdb   :  { %v658_v17 = vadd.f32 %v657_v12, %v595_v9  ;;  %v1181_v12 = vpop.f32.mrf.mxu3 }
  0xe0   :  { %v353_v47 = vpop.f32.mrf.mxu0  ;;  %v1154_v6 = vpop.f32.mrf.mxu1 }
  0xe1   :  { %v596_v14 = vmul.f32 %v353_v47, %v353_v47  ;;  %v523_v18 = vadd.f32 %v522_v13, %v353_v47  ;;  %v601_v47 = vmul.f32 %v1066_v60, %v1066_v60  ;;  %v1176_v7 = vpop.f32.mrf.mxu2 }
  0xe3   :  { %v659_v21 = vadd.f32 %v658_v17, %v596_v14 }
  0xe8   :  { %v356_v51 = vpop.f32.mrf.mxu0  ;;  %v404_v30 = vpop.f32.mrf.mxu1 }
  0xe9   :  { %v597_v20 = vmul.f32 %v356_v51, %v356_v51  ;;  %v524_v22 = vadd.f32 %v523_v18, %v356_v51  ;;  %v608_v18 = vmul.f32 %v1130_v39, %v1130_v39 }
  0xeb   :  { %v660_v25 = vadd.f32 %v659_v21, %v597_v20 }
  0xf0   :  { %v359_v62 = vpop.f32.mrf.mxu0  ;;  %v407_v3 = vpop.f32.mrf.mxu1 }
  0xf1   :  { %v598_v24 = vmul.f32 %v359_v62, %v359_v62  ;;  %v525_v27 = vadd.f32 %v524_v22, %v359_v62  ;;  %v609_v22 = vmul.f32 %v1136_v43, %v1136_v43 }
  0xf3   :  { %v661_v33 = vadd.f32 %v660_v25, %v598_v24  ;;  %v1195_v25 = vpop.f32.mrf.mxu2 }
  0xf8   :  { %v362_v15 = vpop.f32.mrf.mxu0  ;;  %v410_v21 = vpop.f32.mrf.mxu1 }
  0xf9   :  { %v599_v29 = vmul.f32 %v362_v15, %v362_v15  ;;  %v526_v34 = vadd.f32 %v525_v27, %v362_v15  ;;  %v610_v27 = vmul.f32 %v1142_v48, %v1142_v48 }
  0xfb   :  { %v662_v44 = vadd.f32 %v661_v33, %v599_v29  ;;  %v1200_v33 = vpop.f32.mrf.mxu3 }
 0x100   :  { %v365_v37 = vpop.f32.mrf.mxu0 }
 0x101   :  { %v527_v53 = vadd.f32 %v526_v34, %v365_v37  ;;  %v600_v55 = vmul.f32 %v365_v37, %v365_v37 }
 0x103   :  { %v528_v51 = vadd.f32 %v527_v53, %v1066_v60  ;;  %v663_v58 = vadd.f32 %v662_v44, %v600_v55 }
 0x105   :  { %v529_v61 = vadd.f32 %v528_v51, %v1076_v0  ;;  %v664_v62 = vadd.f32 %v663_v58, %v601_v47  ;;  %v613_v51 = vmul.f32 %v404_v30, %v404_v30  ;;  %v413_v58 = vpop.f32.mrf.mxu1 }
 0x107   :  { %v530_v1 = vadd.f32 %v529_v61, %v1086_v10  ;;  %v665_v2 = vadd.f32 %v664_v62, %v602_v59  ;;  %v606_v10 = vmul.f32 %v1116_v31, %v1116_v31  ;;  %v614_v61 = vmul.f32 %v407_v3, %v407_v3  ;;  %v452_v62 = vpop.f32.mrf.mxu2 }
 0x109   :  { %v531_v5 = vadd.f32 %v530_v1, %v1099_v19  ;;  %v666_v60 = vadd.f32 %v665_v2, %v603_v63  ;;  %v607_v19 = vmul.f32 %v1124_v35, %v1124_v35  ;;  %v615_v2 = vmul.f32 %v410_v21, %v410_v21 }
 0x10b   :  { %v532_v0 = vadd.f32 %v531_v5, %v1108_v26  ;;  %v667_v9 = vadd.f32 %v666_v60, %v604_v4  ;;  %v616_v4 = vmul.f32 %v413_v58, %v413_v58 }
 0x10d   :  { %v533_v13 = vadd.f32 %v532_v0, %v1116_v31  ;;  %v668_v14 = vadd.f32 %v667_v9, %v605_v8 }
 0x10f   :  { %v669_v15 = vadd.f32 %v668_v14, %v606_v10  ;;  %v534_v17 = vadd.f32 %v533_v13, %v1124_v35  ;;  %v619_v10 = vmul.f32 %v1118_v32, %v1118_v32 }
 0x111   :  { %v535_v26 = vadd.f32 %v534_v17, %v1130_v39  ;;  %v670_v20 = vadd.f32 %v669_v15, %v607_v19  ;;  %v611_v39 = vmul.f32 %v1148_v52, %v1148_v52  ;;  %v455_v19 = vpop.f32.mrf.mxu2  ;;  %v620_v15 = vmul.f32 %v1126_v36, %v1126_v36 }
 0x113   :  { %v536_v24 = vadd.f32 %v535_v26, %v1136_v43  ;;  %v671_v31 = vadd.f32 %v670_v20, %v608_v18  ;;  %v612_v43 = vmul.f32 %v1154_v6, %v1154_v6  ;;  %v621_v26 = vmul.f32 %v1132_v40, %v1132_v40 }
 0x115   :  { %v537_v35 = vadd.f32 %v536_v24, %v1142_v48  ;;  %v672_v29 = vadd.f32 %v671_v31, %v609_v22  ;;  %v623_v24 = vmul.f32 %v1144_v49, %v1144_v49 }
 0x117   :  { %v538_v34 = vadd.f32 %v537_v35, %v1148_v52  ;;  %v673_v37 = vadd.f32 %v672_v29, %v610_v27  ;;  %v1208_v52 = vpop.f32.mrf.mxu3  ;;  %v624_v27 = vmul.f32 %v1150_v54, %v1150_v54 }
 0x119   :  { %v539_v44 = vadd.f32 %v538_v34, %v1154_v6  ;;  %v674_v53 = vadd.f32 %v673_v37, %v611_v39  ;;  %v617_v6 = vmul.f32 %v1102_v23, %v1102_v23  ;;  %v625_v39 = vmul.f32 %v1156_v11, %v1156_v11 }
 0x11b   :  { %v675_v55 = vadd.f32 %v674_v53, %v612_v43  ;;  %v540_v47 = vadd.f32 %v539_v44, %v404_v30  ;;  %v618_v30 = vmul.f32 %v1110_v28, %v1110_v28  ;;  %v626_v44 = vmul.f32 %v1160_v41, %v1160_v41 }
 0x11c   :  { %v627_v53 = vmul.f32 %v1176_v7, %v1176_v7 }
 0x11d   :  { %v676_v48 = vadd.f32 %v675_v55, %v613_v51  ;;  %v541_v59 = vadd.f32 %v540_v47, %v407_v3 }
 0x11f   :  { %v677_v63 = vadd.f32 %v676_v48, %v614_v61  ;;  %v542_v1 = vadd.f32 %v541_v59, %v410_v21  ;;  %v1222_v18 = vpop.f32.mrf.mxu3  ;;  %v622_v21 = vmul.f32 %v1138_v45, %v1138_v45  ;;  %v629_v59 = vmul.f32 %v452_v62, %v452_v62 }
 0x121   :  { %v678_v5 = vadd.f32 %v677_v63, %v615_v2  ;;  %v543_v60 = vadd.f32 %v542_v1, %v413_v58 }
 0x123   :  { %v544_v8 = vadd.f32 %v543_v60, %v1102_v23  ;;  %v679_v0 = vadd.f32 %v678_v5, %v616_v4 }
 0x125   :  { %v545_v3 = vadd.f32 %v544_v8, %v1110_v28  ;;  %v680_v9 = vadd.f32 %v679_v0, %v617_v6  ;;  %v814_v0 = vmov 0.0  }
 0x126   :  { %39 = vst [vmem:[%s1306_s2] sm:$0x1] %v814_v0 }
 0x127   :  { %v546_v13 = vadd.f32 %v545_v3, %v1118_v32  ;;  %v681_v14 = vadd.f32 %v680_v9, %v618_v30  ;;  %v1239_v37 = vpop.f32.mrf.mxu3  ;;  %40 = vst [vmem:[%s1307_s3] sm:$0x1] %v814_v0  ;;  %v634_v3 = vmul.f32 %v1134_v42, %v1134_v42 }
 0x129   :  { %v547_v17 = vadd.f32 %v546_v13, %v1126_v36  ;;  %v682_v23 = vadd.f32 %v681_v14, %v619_v10  ;;  %v635_v13 = vmul.f32 %v1140_v46, %v1140_v46 }
 0x12b   :  { %v548_v28 = vadd.f32 %v547_v17, %v1132_v40  ;;  %v683_v20 = vadd.f32 %v682_v23, %v620_v15  ;;  %v458_v40 = vpop.f32.mrf.mxu2 }
 0x12c   :  { %v631_v60 = vmul.f32 %v458_v40, %v458_v40 }
 0x12d   :  { %v549_v32 = vadd.f32 %v548_v28, %v1138_v45  ;;  %v684_v22 = vadd.f32 %v683_v20, %v621_v26  ;;  %v637_v26 = vmul.f32 %v1152_v57, %v1152_v57  ;;  %v638_v20 = vmul.f32 %v1158_v16, %v1158_v16 }
 0x12f   :  { %v685_v31 = vadd.f32 %v684_v22, %v622_v21  ;;  %v550_v36 = vadd.f32 %v549_v32, %v1144_v49  ;;  %v500_v2 = vpop.f32.mrf.mxu3  ;;  %v639_v32 = vmul.f32 %v1162_v56, %v1162_v56 }
 0x131   :  { %v551_v35 = vadd.f32 %v550_v36, %v1150_v54  ;;  %v686_v29 = vadd.f32 %v685_v31, %v623_v24 }
 0x133   :  { %v552_v34 = vadd.f32 %v551_v35, %v1156_v11  ;;  %v687_v45 = vadd.f32 %v686_v29, %v624_v27  ;;  %v628_v11 = vmul.f32 %v1195_v25, %v1195_v25  ;;  %v461_v61 = vpop.f32.mrf.mxu2  ;;  %v641_v27 = vmul.f32 %v1200_v33, %v1200_v33 }
 0x134   :  { %v632_v6 = vmul.f32 %v461_v61, %v461_v61  ;;  %v642_v29 = vmul.f32 %v1208_v52, %v1208_v52 }
 0x135   :  { %v553_v49 = vadd.f32 %v552_v34, %v1160_v41  ;;  %v688_v43 = vadd.f32 %v687_v45, %v625_v39  ;;  %v630_v41 = vmul.f32 %v455_v19, %v455_v19 }
 0x137   :  { %v554_v54 = vadd.f32 %v553_v49, %v1176_v7  ;;  %v689_v55 = vadd.f32 %v688_v43, %v626_v44  ;;  %v503_v15 = vpop.f32.mrf.mxu3  ;;  %v644_v44 = vmul.f32 %v1239_v37, %v1239_v37 }
 0x139   :  { %v555_v47 = vadd.f32 %v554_v54, %v1195_v25  ;;  %v690_v51 = vadd.f32 %v689_v55, %v627_v53  ;;  %v633_v25 = vmul.f32 %v1128_v38, %v1128_v38  ;;  %v645_v53 = vmul.f32 %v500_v2, %v500_v2 }
 0x13b   :  { %v691_v58 = vadd.f32 %v690_v51, %v628_v11  ;;  %v556_v48 = vadd.f32 %v555_v47, %v452_v62 }
 0x13d   :  { %v692_v63 = vadd.f32 %v691_v58, %v629_v59  ;;  %v557_v1 = vadd.f32 %v556_v48, %v455_v19 }
 0x13f   :  { %v693_v4 = vadd.f32 %v692_v63, %v630_v41  ;;  %v558_v5 = vadd.f32 %v557_v1, %v458_v40 }
 0x141   :  { %v694_v7 = vadd.f32 %v693_v4, %v631_v60  ;;  %v559_v8 = vadd.f32 %v558_v5, %v461_v61 }
 0x143   :  { %v560_v62 = vadd.f32 %v559_v8, %v1128_v38  ;;  %v695_v30 = vadd.f32 %v694_v7, %v632_v6  ;;  %v636_v38 = vmul.f32 %v1146_v50, %v1146_v50  ;;  %v512_v7 = vld [vmem:[%s1306_s2] sm:$0x1] }
 0x145   :  { %v561_v9 = vadd.f32 %v560_v62, %v1134_v42  ;;  %v696_v10 = vadd.f32 %v695_v30, %v633_v25  ;;  %v584_v25 = vld [vmem:[%s1307_s3] sm:$0x1] }
 0x147   :  { %v562_v14 = vadd.f32 %v561_v9, %v1140_v46  ;;  %v697_v19 = vadd.f32 %v696_v10, %v634_v3 }
 0x149   :  { %v563_v17 = vadd.f32 %v562_v14, %v1146_v50  ;;  %v698_v23 = vadd.f32 %v697_v19, %v635_v13  ;;  %v640_v50 = vmul.f32 %v1181_v12, %v1181_v12 }
 0x14b   :  { %v564_v28 = vadd.f32 %v563_v17, %v1152_v57  ;;  %v699_v42 = vadd.f32 %v698_v23, %v636_v38  ;;  %v506_v57 = vpop.f32.mrf.mxu3 }
 0x14c   :  { %v647_v58 = vmul.f32 %v506_v57, %v506_v57 }
 0x14d   :  { %v565_v21 = vadd.f32 %v564_v28, %v1158_v16  ;;  %v700_v46 = vadd.f32 %v699_v42, %v637_v26 }
 0x14f   :  { %v701_v22 = vadd.f32 %v700_v46, %v638_v20  ;;  %v566_v24 = vadd.f32 %v565_v21, %v1162_v56  ;;  %v643_v56 = vmul.f32 %v1222_v18, %v1222_v18 }
 0x151   :  { %v567_v31 = vadd.f32 %v566_v24, %v1181_v12  ;;  %v702_v36 = vadd.f32 %v701_v22, %v639_v32 }
 0x153   :  { %v568_v35 = vadd.f32 %v567_v31, %v1200_v33  ;;  %v703_v16 = vadd.f32 %v702_v36, %v640_v50  ;;  %v509_v54 = vpop.f32.mrf.mxu3 }
 0x154   :  { %v648_v48 = vmul.f32 %v509_v54, %v509_v54 }
 0x155   :  { %v569_v40 = vadd.f32 %v568_v35, %v1208_v52  ;;  %v704_v39 = vadd.f32 %v703_v16, %v641_v27  ;;  %v646_v52 = vmul.f32 %v503_v15, %v503_v15 }
 0x157   :  { %v570_v34 = vadd.f32 %v569_v40, %v1222_v18  ;;  %v705_v12 = vadd.f32 %v704_v39, %v642_v29 }
 0x159   :  { %v571_v45 = vadd.f32 %v570_v34, %v1239_v37  ;;  %v706_v49 = vadd.f32 %v705_v12, %v643_v56 }
 0x15b   :  { %v707_v33 = vadd.f32 %v706_v49, %v644_v44  ;;  %v572_v43 = vadd.f32 %v571_v45, %v500_v2 }
 0x15d   :  { %v708_v55 = vadd.f32 %v707_v33, %v645_v53  ;;  %v573_v47 = vadd.f32 %v572_v43, %v503_v15 }
 0x15f   :  { %v709_v11 = vadd.f32 %v708_v55, %v646_v52  ;;  %v574_v51 = vadd.f32 %v573_v47, %v506_v57 }
 0x161   :  { %v710_v59 = vadd.f32 %v709_v11, %v647_v58  ;;  %v575_v18 = vadd.f32 %v574_v51, %v509_v54 }
 0x163   :  { %v576_v61 = vrot.slane %v575_v18, 4  ;;  %v711_v63 = vadd.f32 %v710_v59, %v648_v48 }
 0x165   :  { %v577_v1 = vadd.f32 %v576_v61, %v575_v18  ;;  %v712_v41 = vrot.slane %v711_v63, 4 }
 0x167   :  { %v578_v4 = vrot.slane %v577_v1, 2  ;;  %v713_v37 = vadd.f32 %v712_v41, %v711_v63 }
 0x169   :  { %v579_v5 = vadd.f32 %v578_v4, %v577_v1  ;;  %v714_v60 = vrot.slane %v713_v37, 2 }
 0x16b   :  { %v580_v6 = vrot.slane %v579_v5, 1  ;;  %v715_v2 = vadd.f32 %v714_v60, %v713_v37 }
 0x16d   :  { %v581_v8 = vadd.f32 %v580_v6, %v579_v5  ;;  %v716_v0 = vrot.slane %v715_v2, 1 }
 0x16f   :  { %v582_v62 = vadd.f32 %v581_v8, %v512_v7  ;;  %v717_v30 = vadd.f32 %v716_v0, %v715_v2 }
 0x171   :  { %583 = vst [vmem:[%s1306_s2] sm:$0x1] %v582_v62  ;;  %v718_v3 = vadd.f32 %v717_v30, %v584_v25 }
 0x173   :  { %719 = vst [vmem:[%s1307_s3] sm:$0x1] %v718_v3 }

</bundles_post_ra>
